<compile_context>
chip_gen: v7x
topology: tpu7x:2x2x1
jax: 0.10.0
libtpu: 0.0.40
codegen_flags: <defaults>
</compile_context>

<pallas_src>
import functools
import math

import jax
import jax.numpy as jnp
import numpy as np
from jax.experimental import pallas as pl
from jax.experimental.pallas import tpu as pltpu

EPS = 1e-5  # PyTorch BatchNorm2d default eps


# ----------------------------------------------------------------- kernel
def _sta_kernel(x1_ref, x2_ref, w_tg_ref, b_tg_ref, w_pg_ref, b_pg_ref,
                w_out_ref, b_out_ref,
                out1_ref, out2_ref,
                t1_sc, p1_sc, t1t_sc, p1t_sc, a1_sc, a2_sc, *, ci, tn):
    """Fused SpatiotemporalAttentionFull forward for one (batch, N-tile) step."""
    j = pl.program_id(1)

    # ---- once per batch (j == 0): projections + channel ("time") attention ----
    @pl.when(j == 0)
    def _prologue():
        x1 = x1_ref[0]                                        # (C, N) f32
        x2 = x2_ref[0]
        # theta|g applied to x1 and phi|g applied to x2, each as ONE stacked
        # (2*Ci, C) matmul (1x1 conv with BatchNorm folded in).  Kept f32:
        # K = C is tiny and these feed the exp()/softmax path.
        proj1 = jnp.dot(w_tg_ref[...], x1,
                        preferred_element_type=jnp.float32) + b_tg_ref[...]
        proj2 = jnp.dot(w_pg_ref[...], x2,
                        preferred_element_type=jnp.float32) + b_pg_ref[...]
        t1 = proj1[:ci, :]                                    # theta(x1)  (Ci, N)
        g1 = proj1[ci:, :]                                    # g(x1)      (Ci, N)
        p1 = proj2[:ci, :]                                    # phi(x2)    (Ci, N)
        g2 = proj2[ci:, :]                                    # g(x2)      (Ci, N)

        # one transpose of theta/phi per batch -> every later dot is MXU-native
        t1t = t1.T                                            # (N, Ci) f32
        p1t = p1.T                                            # (N, Ci) f32

        # channel ("time") energies, (Ci, Ci) -- tiny, kept f32 for accuracy
        et = jnp.dot(t1, p1t, preferred_element_type=jnp.float32)   # energy_time_1
        ett = jnp.dot(p1, t1t, preferred_element_type=jnp.float32)  # energy_time_2

        def _row_softmax(e):
            z = jnp.exp(e - jnp.max(e, axis=-1, keepdims=True))
            return z * pl.reciprocal(jnp.sum(z, axis=-1, keepdims=True), approx=True)

        et1s = _row_softmax(et)                               # softmax(energy_time_1, -1)
        et2s = _row_softmax(ett)                              # softmax(energy_time_2, -1)

        a1 = jnp.dot(et2s.astype(jnp.bfloat16), g1.astype(jnp.bfloat16),
                     preferred_element_type=jnp.float32)      # energy_time_2s @ g(x1)
        a2 = jnp.dot(et1s.astype(jnp.bfloat16), g2.astype(jnp.bfloat16),
                     preferred_element_type=jnp.float32)      # energy_time_1s @ g(x2)

        # persist bf16 copies for the per-tile spatial stage
        t1_sc[...] = t1.astype(jnp.bfloat16)
        p1_sc[...] = p1.astype(jnp.bfloat16)
        t1t_sc[...] = t1t.astype(jnp.bfloat16)
        p1t_sc[...] = p1t.astype(jnp.bfloat16)
        a1_sc[...] = a1.astype(jnp.bfloat16)
        a2_sc[...] = a2.astype(jnp.bfloat16)

    # ---- every tile: spatial ("space") attention + W projection + residual ----
    off = pl.multiple_of(j * tn, tn)
    x1_t = x1_ref[0, :, pl.ds(off, tn)]                       # (C, TN) f32
    x2_t = x2_ref[0, :, pl.ds(off, tn)]
    p1_t = p1_sc[:, pl.ds(off, tn)]                           # (Ci, TN) bf16
    t1_t = t1_sc[:, pl.ds(off, tn)]                           # (Ci, TN) bf16

    # energy_space_1[:, tile] (n1 on sublanes); softmax over dim -2 == axis 0.
    es1_blk = jnp.dot(t1t_sc[...], p1_t,
                      preferred_element_type=jnp.float32)     # (N, TN) f32
    z1 = jnp.exp(es1_blk - jnp.max(es1_blk, axis=0, keepdims=True))
    es2s_blk = z1 * pl.reciprocal(jnp.sum(z1, axis=0, keepdims=True), approx=True)
    y1_t = jnp.dot(a1_sc[...], es2s_blk.astype(jnp.bfloat16),
                   preferred_element_type=jnp.float32)        # (Ci, TN)

    # energy_space_2[:, tile] (n2 on sublanes); softmax over dim -2 == axis 0.
    es2_blk = jnp.dot(p1t_sc[...], t1_t,
                      preferred_element_type=jnp.float32)     # (N, TN) f32
    z2 = jnp.exp(es2_blk - jnp.max(es2_blk, axis=0, keepdims=True))
    es1s_blk = z2 * pl.reciprocal(jnp.sum(z2, axis=0, keepdims=True), approx=True)
    y2_t = jnp.dot(a2_sc[...], es1s_blk.astype(jnp.bfloat16),
                   preferred_element_type=jnp.float32)        # (Ci, TN)

    # output 1x1 conv W (BN folded) + residuals
    w_out = w_out_ref[...].astype(jnp.bfloat16)               # (C, Ci)
    b_out = b_out_ref[...]                                    # (C, 1)
    out1_ref[0] = x1_t + b_out + jnp.dot(
        w_out, y1_t.astype(jnp.bfloat16), preferred_element_type=jnp.float32)
    out2_ref[0] = x2_t + b_out + jnp.dot(
        w_out, y2_t.astype(jnp.bfloat16), preferred_element_type=jnp.float32)


# ----------------------------------------------------------------- BN folding
def _fold_bn_then_conv(p):
    """Sequential(BatchNorm2d(Cin), Conv2d 1x1) -> single (Cout, Cin) affine."""
    bn_w, bn_b, bn_m, bn_v, cw, cb = p
    scale = bn_w / jnp.sqrt(bn_v + EPS)                       # (Cin,)
    w2d = cw[:, :, 0, 0]                                      # (Cout, Cin)
    w = w2d * scale[None, :]
    b = cb + w2d @ (bn_b - scale * bn_m)
    return w, b


def _fold_conv_then_bn(p):
    """Sequential(Conv2d 1x1, BatchNorm2d(Cout)) -> single (Cout, Cin) affine."""
    cw, cb, bn_w, bn_b, bn_m, bn_v = p
    scale = bn_w / jnp.sqrt(bn_v + EPS)                       # (Cout,)
    w = cw[:, :, 0, 0] * scale[:, None]
    b = (cb - bn_m) * scale + bn_b
    return w, b


# ----------------------------------------------------------------- wrapper
def spatiotemporal_attention_full(x1, x2, params, *, tile_n=None):
    assert x1.shape == x2.shape, "kernel assumes x1 and x2 share (B, C, H, W)"
    B, C, H, W = x1.shape
    N = H * W

    # TODO(synk): BatchNorm is modeled in inference mode (running statistics
    # folded into the neighbouring 1x1 convs); training-mode batch statistics
    # are not reproduced.
    w_t, b_t = _fold_bn_then_conv(params["theta"])
    w_p, b_p = _fold_bn_then_conv(params["phi"])
    w_g, b_g = _fold_bn_then_conv(params["g"])
    w_o, b_o = _fold_conv_then_bn(params["W"])
    Ci = w_t.shape[0]

    # theta & g both read x1, phi & g both read x2 -> two stacked projections.
    w_tg = jnp.concatenate([w_t, w_g], axis=0)                # (2Ci, C)
    b_tg = jnp.concatenate([b_t, b_g], axis=0)[:, None]       # (2Ci, 1)
    w_pg = jnp.concatenate([w_p, w_g], axis=0)
    b_pg = jnp.concatenate([b_p, b_g], axis=0)[:, None]
    b_o = b_o[:, None]                                        # (C, 1)

    if tile_n is None:
        tile_n = 128 if N % 128 == 0 else N                   # lane-dense tiles
    assert N % tile_n == 0 and (tile_n % 128 == 0 or tile_n == N)
    nj = N // tile_n

    x1f = x1.reshape(B, C, N).astype(jnp.float32)
    x2f = x2.reshape(B, C, N).astype(jnp.float32)

    kernel = functools.partial(_sta_kernel, ci=Ci, tn=tile_n)

    def full_spec(shape):
        return pl.BlockSpec(shape, lambda b, j: (0,) * len(shape))

    out1, out2 = pl.pallas_call(
        kernel,
        out_shape=(jax.ShapeDtypeStruct((B, C, N), jnp.float32),
                   jax.ShapeDtypeStruct((B, C, N), jnp.float32)),
        grid_spec=pltpu.PrefetchScalarGridSpec(
            num_scalar_prefetch=0,
            grid=(B, nj),
            in_specs=[
                pl.BlockSpec((1, C, N), lambda b, j: (b, 0, 0)),   # x1 (resident per batch)
                pl.BlockSpec((1, C, N), lambda b, j: (b, 0, 0)),   # x2
                full_spec((2 * Ci, C)),                            # [theta; g] weight
                full_spec((2 * Ci, 1)),                            # [theta; g] bias
                full_spec((2 * Ci, C)),                            # [phi; g] weight
                full_spec((2 * Ci, 1)),                            # [phi; g] bias
                full_spec((C, Ci)),                                # W weight
                full_spec((C, 1)),                                 # W bias
            ],
            out_specs=[
                pl.BlockSpec((1, C, tile_n), lambda b, j: (b, 0, j)),
                pl.BlockSpec((1, C, tile_n), lambda b, j: (b, 0, j)),
            ],
            scratch_shapes=[
                pltpu.VMEM((Ci, N), jnp.bfloat16),   # theta(x1)
                pltpu.VMEM((Ci, N), jnp.bfloat16),   # phi(x2)
                pltpu.VMEM((N, Ci), jnp.bfloat16),   # theta(x1)^T
                pltpu.VMEM((N, Ci), jnp.bfloat16),   # phi(x2)^T
                pltpu.VMEM((Ci, N), jnp.bfloat16),   # A1 = energy_time_2s @ g(x1)
                pltpu.VMEM((Ci, N), jnp.bfloat16),   # A2 = energy_time_1s @ g(x2)
            ],
        ),
        # residual inputs double as the output buffers (no extra HBM alloc).
        input_output_aliases={0: 0, 1: 1},
        compiler_params=pltpu.CompilerParams(
            dimension_semantics=("parallel", "arbitrary")),
    )(x1f, x2f, w_tg, b_tg, w_pg, b_pg, w_o, b_o)

    return out1.reshape(B, C, H, W), out2.reshape(B, C, H, W)


# ----------------------------------------------------------------- params
def init_params(key, in_channels, inter_channels=None):
    """Synthetic parameters matching SpatiotemporalAttentionFull's shapes."""
    if inter_channels is None:
        inter_channels = max(in_channels // 2, 1)
    Ci, C = inter_channels, in_channels

    def conv(k, cout, cin):
        k1, k2 = jax.random.split(k)
        bound = 1.0 / math.sqrt(cin)
        w = jax.random.uniform(k1, (cout, cin, 1, 1), jnp.float32, -bound, bound)
        b = jax.random.uniform(k2, (cout,), jnp.float32, -bound, bound)
        return w, b

    def bn(k, c):
        k1, k2, k3, k4 = jax.random.split(k, 4)
        w = jax.random.uniform(k1, (c,), jnp.float32, 0.5, 1.5)
        b = jax.random.uniform(k2, (c,), jnp.float32, -0.2, 0.2)
        mean = jax.random.uniform(k3, (c,), jnp.float32, -0.2, 0.2)
        var = jax.random.uniform(k4, (c,), jnp.float32, 0.5, 1.5)
        return w, b, mean, var

    def bn_then_conv(k, cout, cin):
        kb, kc = jax.random.split(k)
        return bn(kb, cin) + conv(kc, cout, cin)

    def conv_then_bn(k, cout, cin):
        kc, kb = jax.random.split(k)
        return conv(kc, cout, cin) + bn(kb, cout)

    kg, kt, kp, kw = jax.random.split(key, 4)
    return {
        "g": bn_then_conv(kg, Ci, C),
        "theta": bn_then_conv(kt, Ci, C),
        "phi": bn_then_conv(kp, Ci, C),
        "W": conv_then_bn(kw, C, Ci),
    }


# ----------------------------------------------------------------- reference
def ref_forward(x1, x2, params):
    B, C, H, W = x1.shape

    def bn2d(x, w, b, mean, var):
        inv = 1.0 / jnp.sqrt(var + EPS)
        return ((x - mean[None, :, None, None]) * (w * inv)[None, :, None, None]
                + b[None, :, None, None])

    def conv1x1(x, w, b):
        return jnp.einsum("oc,bchw->bohw", w[:, :, 0, 0], x) + b[None, :, None, None]

    def bn_then_conv(x, p):
        bw, bb, bm, bv, cw, cb = p
        return conv1x1(bn2d(x, bw, bb, bm, bv), cw, cb)

    def conv_then_bn(x, p):
        cw, cb, bw, bb, bm, bv = p
        return bn2d(conv1x1(x, cw, cb), bw, bb, bm, bv)

    Ci = params["theta"][4].shape[0]
    g_x11 = bn_then_conv(x1, params["g"]).reshape(B, Ci, -1)
    g_x21 = bn_then_conv(x2, params["g"]).reshape(B, Ci, -1)
    theta_x1 = bn_then_conv(x1, params["theta"]).reshape(B, Ci, -1)
    phi_x1 = bn_then_conv(x2, params["phi"]).reshape(B, Ci, -1)
    theta_x2 = theta_x1.transpose(0, 2, 1)
    phi_x2 = phi_x1.transpose(0, 2, 1)

    energy_time_1 = jnp.matmul(theta_x1, phi_x2)
    energy_time_2 = energy_time_1.transpose(0, 2, 1)
    energy_space_1 = jnp.matmul(theta_x2, phi_x1)
    energy_space_2 = energy_space_1.transpose(0, 2, 1)

    et1s = jax.nn.softmax(energy_time_1, axis=-1)
    et2s = jax.nn.softmax(energy_time_2, axis=-1)
    es2s = jax.nn.softmax(energy_space_1, axis=-2)
    es1s = jax.nn.softmax(energy_space_2, axis=-2)

    y1 = jnp.matmul(jnp.matmul(et2s, g_x11), es2s).reshape(B, Ci, H, W)
    y2 = jnp.matmul(jnp.matmul(et1s, g_x21), es1s).reshape(B, Ci, H, W)
    return (x1 + conv_then_bn(y1, params["W"]),
            x2 + conv_then_bn(y2, params["W"]))


# ----------------------------------------------------------------- main
if __name__ == "__main__":
    key = jax.random.PRNGKey(0)
    B, C, H, W = 2, 16, 16, 16          # Ci = 8, N = 256 -> two spatial tiles of 128
    k1, k2, kp = jax.random.split(key, 3)
    x1 = jax.random.normal(k1, (B, C, H, W), jnp.float32)
    x2 = jax.random.normal(k2, (B, C, H, W), jnp.float32)
    params = init_params(kp, C)

    fwd = jax.jit(spatiotemporal_attention_full)
    out1, out2 = fwd(x1, x2, params)
    jax.block_until_ready((out1, out2))

    ref1, ref2 = ref_forward(x1, x2, params)
    # Tolerance: the kernel feeds the MXU bf16 operands (with f32 accumulation
    # and f32 softmax) while the reference is pure f32.
    np.testing.assert_allclose(np.asarray(out1), np.asarray(ref1), rtol=5e-2, atol=5e-2)
    np.testing.assert_allclose(np.asarray(out2), np.asarray(ref2), rtol=5e-2, atol=5e-2)
    print("KERNEL_OK")
</pallas_src>

<mosaic_0001>
module attributes {stable_mosaic.version = 11 : i64} {
  func.func @_sta_kernel(%arg0: i32, %arg1: i32, %arg2: memref<1x16x256xf32, #tpu.memory_space<vmem>>, %arg3: memref<1x16x256xf32, #tpu.memory_space<vmem>>, %arg4: memref<16x16xf32, #tpu.memory_space<vmem>>, %arg5: memref<16x1xf32, #tpu.memory_space<vmem>>, %arg6: memref<16x16xf32, #tpu.memory_space<vmem>>, %arg7: memref<16x1xf32, #tpu.memory_space<vmem>>, %arg8: memref<16x8xf32, #tpu.memory_space<vmem>>, %arg9: memref<16x1xf32, #tpu.memory_space<vmem>>, %arg10: memref<1x16x128xf32, #tpu.memory_space<vmem>>, %arg11: memref<1x16x128xf32, #tpu.memory_space<vmem>>, %arg12: memref<8x256xbf16, #tpu.memory_space<vmem>>, %arg13: memref<8x256xbf16, #tpu.memory_space<vmem>>, %arg14: memref<256x8xbf16, #tpu.memory_space<vmem>>, %arg15: memref<256x8xbf16, #tpu.memory_space<vmem>>, %arg16: memref<8x256xbf16, #tpu.memory_space<vmem>>, %arg17: memref<8x256xbf16, #tpu.memory_space<vmem>>) attributes {dimension_semantics = [#tpu.dimension_semantics<parallel>, #tpu.dimension_semantics<arbitrary>], iteration_bounds = array<i64: 2, 2>, scalar_prefetch = 0 : i64, scratch_operands = 6 : i64, tpu.core_type = #tpu.core_type<tc>, window_params = [{transform_indices = @transform_0, window_bounds = array<i64: 1, 16, 256>}, {transform_indices = @transform_1, window_bounds = array<i64: 1, 16, 256>}, {pipeline_mode = #tpu.pipeline_mode<synchronous>, transform_indices = @transform_2, window_bounds = array<i64: 16, 16>}, {pipeline_mode = #tpu.pipeline_mode<synchronous>, transform_indices = @transform_3, window_bounds = array<i64: 16, 1>}, {pipeline_mode = #tpu.pipeline_mode<synchronous>, transform_indices = @transform_4, window_bounds = array<i64: 16, 16>}, {pipeline_mode = #tpu.pipeline_mode<synchronous>, transform_indices = @transform_5, window_bounds = array<i64: 16, 1>}, {pipeline_mode = #tpu.pipeline_mode<synchronous>, transform_indices = @transform_6, window_bounds = array<i64: 16, 8>}, {pipeline_mode = #tpu.pipeline_mode<synchronous>, transform_indices = @transform_7, window_bounds = array<i64: 16, 1>}, {transform_indices = @transform_8, window_bounds = array<i64: 1, 16, 128>}, {transform_indices = @transform_9, window_bounds = array<i64: 1, 16, 128>}]} {
    %c0_i32 = arith.constant 0 : i32
    %0 = arith.cmpi eq, %arg1, %c0_i32 : i32
    %1 = arith.extui %0 : i1 to i32
    %c0_i32_0 = arith.constant 0 : i32
    %2 = arith.cmpi ne, %1, %c0_i32_0 : i32
    scf.if %2 {
      %c0_33 = arith.constant 0 : index
      %c0_34 = arith.constant 0 : index
      %c0_35 = arith.constant 0 : index
      %64 = vector.load %arg2[%c0_33, %c0_34, %c0_35] : memref<1x16x256xf32, #tpu.memory_space<vmem>>, vector<1x16x256xf32>
      %65 = vector.shape_cast %64 : vector<1x16x256xf32> to vector<16x256xf32>
      %c0_36 = arith.constant 0 : index
      %c0_37 = arith.constant 0 : index
      %c0_38 = arith.constant 0 : index
      %66 = vector.load %arg3[%c0_36, %c0_37, %c0_38] : memref<1x16x256xf32, #tpu.memory_space<vmem>>, vector<1x16x256xf32>
      %67 = vector.shape_cast %66 : vector<1x16x256xf32> to vector<16x256xf32>
      %c0_39 = arith.constant 0 : index
      %c0_40 = arith.constant 0 : index
      %68 = vector.load %arg4[%c0_39, %c0_40] : memref<16x16xf32, #tpu.memory_space<vmem>>, vector<16x16xf32>
      %cst_41 = arith.constant dense<0.000000e+00> : vector<16x256xf32>
      %69 = tpu.matmul %68, %65, %cst_41 {dimension_numbers = #tpu.dot_dimension_numbers<[1], [0], [0], [1], [0, 0, 1, 1], [], []>} : vector<16x16xf32>, vector<16x256xf32>, vector<16x256xf32> -> vector<16x256xf32>
      %c0_42 = arith.constant 0 : index
      %c0_43 = arith.constant 0 : index
      %70 = vector.load %arg5[%c0_42, %c0_43] : memref<16x1xf32, #tpu.memory_space<vmem>>, vector<16x1xf32>
      %71 = vector.broadcast %70 : vector<16x1xf32> to vector<16x256xf32>
      %72 = arith.addf %69, %71 : vector<16x256xf32>
      %c0_44 = arith.constant 0 : index
      %c0_45 = arith.constant 0 : index
      %73 = vector.load %arg6[%c0_44, %c0_45] : memref<16x16xf32, #tpu.memory_space<vmem>>, vector<16x16xf32>
      %cst_46 = arith.constant dense<0.000000e+00> : vector<16x256xf32>
      %74 = tpu.matmul %73, %67, %cst_46 {dimension_numbers = #tpu.dot_dimension_numbers<[1], [0], [0], [1], [0, 0, 1, 1], [], []>} : vector<16x16xf32>, vector<16x256xf32>, vector<16x256xf32> -> vector<16x256xf32>
      %c0_47 = arith.constant 0 : index
      %c0_48 = arith.constant 0 : index
      %75 = vector.load %arg7[%c0_47, %c0_48] : memref<16x1xf32, #tpu.memory_space<vmem>>, vector<16x1xf32>
      %76 = vector.broadcast %75 : vector<16x1xf32> to vector<16x256xf32>
      %77 = arith.addf %74, %76 : vector<16x256xf32>
      %78 = vector.extract_strided_slice %72 {offsets = [0, 0], sizes = [8, 256], strides = [1, 1]} : vector<16x256xf32> to vector<8x256xf32>
      %79 = vector.extract_strided_slice %72 {offsets = [8, 0], sizes = [8, 256], strides = [1, 1]} : vector<16x256xf32> to vector<8x256xf32>
      %80 = vector.extract_strided_slice %77 {offsets = [0, 0], sizes = [8, 256], strides = [1, 1]} : vector<16x256xf32> to vector<8x256xf32>
      %81 = vector.extract_strided_slice %77 {offsets = [8, 0], sizes = [8, 256], strides = [1, 1]} : vector<16x256xf32> to vector<8x256xf32>
      %82 = tpu.transpose %78, [1, 0] : vector<8x256xf32> -> vector<256x8xf32>
      %83 = tpu.transpose %80, [1, 0] : vector<8x256xf32> -> vector<256x8xf32>
      %cst_49 = arith.constant dense<0.000000e+00> : vector<8x8xf32>
      %84 = tpu.matmul %78, %83, %cst_49 {dimension_numbers = #tpu.dot_dimension_numbers<[1], [0], [0], [1], [0, 0, 1, 1], [], []>} : vector<8x256xf32>, vector<256x8xf32>, vector<8x8xf32> -> vector<8x8xf32>
      %cst_50 = arith.constant dense<0.000000e+00> : vector<8x8xf32>
      %85 = tpu.matmul %80, %82, %cst_50 {dimension_numbers = #tpu.dot_dimension_numbers<[1], [0], [0], [1], [0, 0, 1, 1], [], []>} : vector<8x256xf32>, vector<256x8xf32>, vector<8x8xf32> -> vector<8x8xf32>
      %cst_51 = arith.constant dense<0xFF800000> : vector<8xf32>
      %86 = vector.multi_reduction <maximumf>, %84, %cst_51 [1] : vector<8x8xf32> to vector<8xf32>
      %87 = vector.shape_cast %86 : vector<8xf32> to vector<8x1xf32>
      %88 = vector.broadcast %87 : vector<8x1xf32> to vector<8x8xf32>
      %89 = arith.subf %84, %88 : vector<8x8xf32>
      %90 = math.exp %89 : vector<8x8xf32>
      %cst_52 = arith.constant dense<0.000000e+00> : vector<8xf32>
      %91 = vector.multi_reduction <add>, %90, %cst_52 [1] : vector<8x8xf32> to vector<8xf32>
      %92 = vector.shape_cast %91 : vector<8xf32> to vector<8x1xf32>
      %93 = tpu.reciprocal %92 {approx = true} : vector<8x1xf32> -> vector<8x1xf32>
      %94 = vector.broadcast %93 : vector<8x1xf32> to vector<8x8xf32>
      %95 = arith.mulf %90, %94 : vector<8x8xf32>
      %cst_53 = arith.constant dense<0xFF800000> : vector<8xf32>
      %96 = vector.multi_reduction <maximumf>, %85, %cst_53 [1] : vector<8x8xf32> to vector<8xf32>
      %97 = vector.shape_cast %96 : vector<8xf32> to vector<8x1xf32>
      %98 = vector.broadcast %97 : vector<8x1xf32> to vector<8x8xf32>
      %99 = arith.subf %85, %98 : vector<8x8xf32>
      %100 = math.exp %99 : vector<8x8xf32>
      %cst_54 = arith.constant dense<0.000000e+00> : vector<8xf32>
      %101 = vector.multi_reduction <add>, %100, %cst_54 [1] : vector<8x8xf32> to vector<8xf32>
      %102 = vector.shape_cast %101 : vector<8xf32> to vector<8x1xf32>
      %103 = tpu.reciprocal %102 {approx = true} : vector<8x1xf32> -> vector<8x1xf32>
      %104 = vector.broadcast %103 : vector<8x1xf32> to vector<8x8xf32>
      %105 = arith.mulf %100, %104 : vector<8x8xf32>
      %106 = arith.truncf %105 : vector<8x8xf32> to vector<8x8xbf16>
      %107 = arith.truncf %79 : vector<8x256xf32> to vector<8x256xbf16>
      %cst_55 = arith.constant dense<0.000000e+00> : vector<8x256xf32>
      %108 = tpu.matmul %106, %107, %cst_55 {dimension_numbers = #tpu.dot_dimension_numbers<[1], [0], [0], [1], [0, 0, 1, 1], [], []>} : vector<8x8xbf16>, vector<8x256xbf16>, vector<8x256xf32> -> vector<8x256xf32>
      %109 = arith.truncf %95 : vector<8x8xf32> to vector<8x8xbf16>
      %110 = arith.truncf %81 : vector<8x256xf32> to vector<8x256xbf16>
      %cst_56 = arith.constant dense<0.000000e+00> : vector<8x256xf32>
      %111 = tpu.matmul %109, %110, %cst_56 {dimension_numbers = #tpu.dot_dimension_numbers<[1], [0], [0], [1], [0, 0, 1, 1], [], []>} : vector<8x8xbf16>, vector<8x256xbf16>, vector<8x256xf32> -> vector<8x256xf32>
      %112 = arith.truncf %78 : vector<8x256xf32> to vector<8x256xbf16>
      %c0_57 = arith.constant 0 : index
      %c0_58 = arith.constant 0 : index
      %113 = vector.load %arg12[%c0_57, %c0_58] : memref<8x256xbf16, #tpu.memory_space<vmem>>, vector<8x256xbf16>
      tpu.vector_store %arg12[%c0_57, %c0_58], %112 {strides = array<i32>} : memref<8x256xbf16, #tpu.memory_space<vmem>>, vector<8x256xbf16>,
      %114 = arith.truncf %80 : vector<8x256xf32> to vector<8x256xbf16>
      %c0_59 = arith.constant 0 : index
      %c0_60 = arith.constant 0 : index
      %115 = vector.load %arg13[%c0_59, %c0_60] : memref<8x256xbf16, #tpu.memory_space<vmem>>, vector<8x256xbf16>
      tpu.vector_store %arg13[%c0_59, %c0_60], %114 {strides = array<i32>} : memref<8x256xbf16, #tpu.memory_space<vmem>>, vector<8x256xbf16>,
      %116 = arith.truncf %82 : vector<256x8xf32> to vector<256x8xbf16>
      %c0_61 = arith.constant 0 : index
      %c0_62 = arith.constant 0 : index
      %117 = vector.load %arg14[%c0_61, %c0_62] : memref<256x8xbf16, #tpu.memory_space<vmem>>, vector<256x8xbf16>
      tpu.vector_store %arg14[%c0_61, %c0_62], %116 {strides = array<i32>} : memref<256x8xbf16, #tpu.memory_space<vmem>>, vector<256x8xbf16>,
      %118 = arith.truncf %83 : vector<256x8xf32> to vector<256x8xbf16>
      %c0_63 = arith.constant 0 : index
      %c0_64 = arith.constant 0 : index
      %119 = vector.load %arg15[%c0_63, %c0_64] : memref<256x8xbf16, #tpu.memory_space<vmem>>, vector<256x8xbf16>
      tpu.vector_store %arg15[%c0_63, %c0_64], %118 {strides = array<i32>} : memref<256x8xbf16, #tpu.memory_space<vmem>>, vector<256x8xbf16>,
      %120 = arith.truncf %108 : vector<8x256xf32> to vector<8x256xbf16>
      %c0_65 = arith.constant 0 : index
      %c0_66 = arith.constant 0 : index
      %121 = vector.load %arg16[%c0_65, %c0_66] : memref<8x256xbf16, #tpu.memory_space<vmem>>, vector<8x256xbf16>
      tpu.vector_store %arg16[%c0_65, %c0_66], %120 {strides = array<i32>} : memref<8x256xbf16, #tpu.memory_space<vmem>>, vector<8x256xbf16>,
      %122 = arith.truncf %111 : vector<8x256xf32> to vector<8x256xbf16>
      %c0_67 = arith.constant 0 : index
      %c0_68 = arith.constant 0 : index
      %123 = vector.load %arg17[%c0_67, %c0_68] : memref<8x256xbf16, #tpu.memory_space<vmem>>, vector<8x256xbf16>
      tpu.vector_store %arg17[%c0_67, %c0_68], %122 {strides = array<i32>} : memref<8x256xbf16, #tpu.memory_space<vmem>>, vector<8x256xbf16>,
    } else {
    }
    %c128_i32 = arith.constant 128 : i32
    %3 = arith.muli %arg1, %c128_i32 : i32
    %4 = tpu.assume_multiple %3, 128 : i32
    %c0 = arith.constant 0 : index
    %c0_1 = arith.constant 0 : index
    %5 = arith.index_cast %4 : i32 to index
    %6 = vector.load %arg2[%c0, %c0_1, %5] : memref<1x16x256xf32, #tpu.memory_space<vmem>>, vector<1x16x128xf32>
    %7 = vector.shape_cast %6 : vector<1x16x128xf32> to vector<16x128xf32>
    %c0_2 = arith.constant 0 : index
    %c0_3 = arith.constant 0 : index
    %8 = arith.index_cast %4 : i32 to index
    %9 = vector.load %arg3[%c0_2, %c0_3, %8] : memref<1x16x256xf32, #tpu.memory_space<vmem>>, vector<1x16x128xf32>
    %10 = vector.shape_cast %9 : vector<1x16x128xf32> to vector<16x128xf32>
    %c0_4 = arith.constant 0 : index
    %11 = arith.index_cast %4 : i32 to index
    %12 = vector.load %arg13[%c0_4, %11] : memref<8x256xbf16, #tpu.memory_space<vmem>>, vector<8x128xbf16>
    %c0_5 = arith.constant 0 : index
    %13 = arith.index_cast %4 : i32 to index
    %14 = vector.load %arg12[%c0_5, %13] : memref<8x256xbf16, #tpu.memory_space<vmem>>, vector<8x128xbf16>
    %c0_6 = arith.constant 0 : index
    %c0_7 = arith.constant 0 : index
    %15 = vector.load %arg14[%c0_6, %c0_7] : memref<256x8xbf16, #tpu.memory_space<vmem>>, vector<256x8xbf16>
    %cst = arith.constant dense<0.000000e+00> : vector<256x128xf32>
    %16 = tpu.matmul %15, %12, %cst {dimension_numbers = #tpu.dot_dimension_numbers<[1], [0], [0], [1], [0, 0, 1, 1], [], []>} : vector<256x8xbf16>, vector<8x128xbf16>, vector<256x128xf32> -> vector<256x128xf32>
    %cst_8 = arith.constant dense<0xFF800000> : vector<128xf32>
    %17 = vector.multi_reduction <maximumf>, %16, %cst_8 [0] : vector<256x128xf32> to vector<128xf32>
    %18 = vector.shape_cast %17 : vector<128xf32> to vector<1x128xf32>
    %19 = vector.broadcast %18 : vector<1x128xf32> to vector<256x128xf32>
    %20 = arith.subf %16, %19 : vector<256x128xf32>
    %21 = math.exp %20 : vector<256x128xf32>
    %cst_9 = arith.constant dense<0.000000e+00> : vector<128xf32>
    %22 = vector.multi_reduction <add>, %21, %cst_9 [0] : vector<256x128xf32> to vector<128xf32>
    %23 = vector.shape_cast %22 : vector<128xf32> to vector<1x128xf32>
    %24 = tpu.reciprocal %23 {approx = true} : vector<1x128xf32> -> vector<1x128xf32>
    %25 = vector.broadcast %24 : vector<1x128xf32> to vector<256x128xf32>
    %26 = arith.mulf %21, %25 : vector<256x128xf32>
    %c0_10 = arith.constant 0 : index
    %c0_11 = arith.constant 0 : index
    %27 = vector.load %arg16[%c0_10, %c0_11] : memref<8x256xbf16, #tpu.memory_space<vmem>>, vector<8x256xbf16>
    %28 = arith.truncf %26 : vector<256x128xf32> to vector<256x128xbf16>
    %cst_12 = arith.constant dense<0.000000e+00> : vector<8x128xf32>
    %29 = tpu.matmul %27, %28, %cst_12 {dimension_numbers = #tpu.dot_dimension_numbers<[1], [0], [0], [1], [0, 0, 1, 1], [], []>} : vector<8x256xbf16>, vector<256x128xbf16>, vector<8x128xf32> -> vector<8x128xf32>
    %c0_13 = arith.constant 0 : index
    %c0_14 = arith.constant 0 : index
    %30 = vector.load %arg15[%c0_13, %c0_14] : memref<256x8xbf16, #tpu.memory_space<vmem>>, vector<256x8xbf16>
    %cst_15 = arith.constant dense<0.000000e+00> : vector<256x128xf32>
    %31 = tpu.matmul %30, %14, %cst_15 {dimension_numbers = #tpu.dot_dimension_numbers<[1], [0], [0], [1], [0, 0, 1, 1], [], []>} : vector<256x8xbf16>, vector<8x128xbf16>, vector<256x128xf32> -> vector<256x128xf32>
    %cst_16 = arith.constant dense<0xFF800000> : vector<128xf32>
    %32 = vector.multi_reduction <maximumf>, %31, %cst_16 [0] : vector<256x128xf32> to vector<128xf32>
    %33 = vector.shape_cast %32 : vector<128xf32> to vector<1x128xf32>
    %34 = vector.broadcast %33 : vector<1x128xf32> to vector<256x128xf32>
    %35 = arith.subf %31, %34 : vector<256x128xf32>
    %36 = math.exp %35 : vector<256x128xf32>
    %cst_17 = arith.constant dense<0.000000e+00> : vector<128xf32>
    %37 = vector.multi_reduction <add>, %36, %cst_17 [0] : vector<256x128xf32> to vector<128xf32>
    %38 = vector.shape_cast %37 : vector<128xf32> to vector<1x128xf32>
    %39 = tpu.reciprocal %38 {approx = true} : vector<1x128xf32> -> vector<1x128xf32>
    %40 = vector.broadcast %39 : vector<1x128xf32> to vector<256x128xf32>
    %41 = arith.mulf %36, %40 : vector<256x128xf32>
    %c0_18 = arith.constant 0 : index
    %c0_19 = arith.constant 0 : index
    %42 = vector.load %arg17[%c0_18, %c0_19] : memref<8x256xbf16, #tpu.memory_space<vmem>>, vector<8x256xbf16>
    %43 = arith.truncf %41 : vector<256x128xf32> to vector<256x128xbf16>
    %cst_20 = arith.constant dense<0.000000e+00> : vector<8x128xf32>
    %44 = tpu.matmul %42, %43, %cst_20 {dimension_numbers = #tpu.dot_dimension_numbers<[1], [0], [0], [1], [0, 0, 1, 1], [], []>} : vector<8x256xbf16>, vector<256x128xbf16>, vector<8x128xf32> -> vector<8x128xf32>
    %c0_21 = arith.constant 0 : index
    %c0_22 = arith.constant 0 : index
    %45 = vector.load %arg8[%c0_21, %c0_22] : memref<16x8xf32, #tpu.memory_space<vmem>>, vector<16x8xf32>
    %46 = arith.truncf %45 : vector<16x8xf32> to vector<16x8xbf16>
    %c0_23 = arith.constant 0 : index
    %c0_24 = arith.constant 0 : index
    %47 = vector.load %arg9[%c0_23, %c0_24] : memref<16x1xf32, #tpu.memory_space<vmem>>, vector<16x1xf32>
    %48 = vector.broadcast %47 : vector<16x1xf32> to vector<16x128xf32>
    %49 = arith.addf %7, %48 : vector<16x128xf32>
    %50 = arith.truncf %29 : vector<8x128xf32> to vector<8x128xbf16>
    %cst_25 = arith.constant dense<0.000000e+00> : vector<16x128xf32>
    %51 = tpu.matmul %46, %50, %cst_25 {dimension_numbers = #tpu.dot_dimension_numbers<[1], [0], [0], [1], [0, 0, 1, 1], [], []>} : vector<16x8xbf16>, vector<8x128xbf16>, vector<16x128xf32> -> vector<16x128xf32>
    %52 = arith.addf %49, %51 : vector<16x128xf32>
    %c0_26 = arith.constant 0 : index
    %c0_27 = arith.constant 0 : index
    %c0_28 = arith.constant 0 : index
    %53 = vector.load %arg10[%c0_26, %c0_27, %c0_28] : memref<1x16x128xf32, #tpu.memory_space<vmem>>, vector<1x16x128xf32>
    %54 = vector.shape_cast %53 : vector<1x16x128xf32> to vector<16x128xf32>
    %55 = vector.shape_cast %52 : vector<16x128xf32> to vector<1x16x128xf32>
    tpu.vector_store %arg10[%c0_26, %c0_27, %c0_28], %55 {strides = array<i32>} : memref<1x16x128xf32, #tpu.memory_space<vmem>>, vector<1x16x128xf32>,
    %56 = vector.broadcast %47 : vector<16x1xf32> to vector<16x128xf32>
    %57 = arith.addf %10, %56 : vector<16x128xf32>
    %58 = arith.truncf %44 : vector<8x128xf32> to vector<8x128xbf16>
    %cst_29 = arith.constant dense<0.000000e+00> : vector<16x128xf32>
    %59 = tpu.matmul %46, %58, %cst_29 {dimension_numbers = #tpu.dot_dimension_numbers<[1], [0], [0], [1], [0, 0, 1, 1], [], []>} : vector<16x8xbf16>, vector<8x128xbf16>, vector<16x128xf32> -> vector<16x128xf32>
    %60 = arith.addf %57, %59 : vector<16x128xf32>
    %c0_30 = arith.constant 0 : index
    %c0_31 = arith.constant 0 : index
    %c0_32 = arith.constant 0 : index
    %61 = vector.load %arg11[%c0_30, %c0_31, %c0_32] : memref<1x16x128xf32, #tpu.memory_space<vmem>>, vector<1x16x128xf32>
    %62 = vector.shape_cast %61 : vector<1x16x128xf32> to vector<16x128xf32>
    %63 = vector.shape_cast %60 : vector<16x128xf32> to vector<1x16x128xf32>
    tpu.vector_store %arg11[%c0_30, %c0_31, %c0_32], %63 {strides = array<i32>} : memref<1x16x128xf32, #tpu.memory_space<vmem>>, vector<1x16x128xf32>,
    return
  }
  func.func @transform_0(%arg0: i32, %arg1: i32) -> (i32, i32, i32) {
    %c0_i32 = arith.constant 0 : i32
    %c0_i32_0 = arith.constant 0 : i32
    %c0_i32_1 = arith.constant 0 : i32
    return %arg0, %c0_i32, %c0_i32_0 : i32, i32, i32
  }
  func.func @transform_1(%arg0: i32, %arg1: i32) -> (i32, i32, i32) {
    %c0_i32 = arith.constant 0 : i32
    %c0_i32_0 = arith.constant 0 : i32
    %c0_i32_1 = arith.constant 0 : i32
    return %arg0, %c0_i32, %c0_i32_0 : i32, i32, i32
  }
  func.func @transform_2(%arg0: i32, %arg1: i32) -> (i32, i32) {
    %c0_i32 = arith.constant 0 : i32
    %c0_i32_0 = arith.constant 0 : i32
    %c0_i32_1 = arith.constant 0 : i32
    return %c0_i32, %c0_i32_0 : i32, i32
  }
  func.func @transform_3(%arg0: i32, %arg1: i32) -> (i32, i32) {
    %c0_i32 = arith.constant 0 : i32
    %c0_i32_0 = arith.constant 0 : i32
    %c0_i32_1 = arith.constant 0 : i32
    return %c0_i32, %c0_i32_0 : i32, i32
  }
  func.func @transform_4(%arg0: i32, %arg1: i32) -> (i32, i32) {
    %c0_i32 = arith.constant 0 : i32
    %c0_i32_0 = arith.constant 0 : i32
    %c0_i32_1 = arith.constant 0 : i32
    return %c0_i32, %c0_i32_0 : i32, i32
  }
  func.func @transform_5(%arg0: i32, %arg1: i32) -> (i32, i32) {
    %c0_i32 = arith.constant 0 : i32
    %c0_i32_0 = arith.constant 0 : i32
    %c0_i32_1 = arith.constant 0 : i32
    return %c0_i32, %c0_i32_0 : i32, i32
  }
  func.func @transform_6(%arg0: i32, %arg1: i32) -> (i32, i32) {
    %c0_i32 = arith.constant 0 : i32
    %c0_i32_0 = arith.constant 0 : i32
    %c0_i32_1 = arith.constant 0 : i32
    return %c0_i32, %c0_i32_0 : i32, i32
  }
  func.func @transform_7(%arg0: i32, %arg1: i32) -> (i32, i32) {
    %c0_i32 = arith.constant 0 : i32
    %c0_i32_0 = arith.constant 0 : i32
    %c0_i32_1 = arith.constant 0 : i32
    return %c0_i32, %c0_i32_0 : i32, i32
  }
  func.func @transform_8(%arg0: i32, %arg1: i32) -> (i32, i32, i32) {
    %c0_i32 = arith.constant 0 : i32
    %c0_i32_0 = arith.constant 0 : i32
    return %arg0, %c0_i32, %arg1 : i32, i32, i32
  }
  func.func @transform_9(%arg0: i32, %arg1: i32) -> (i32, i32, i32) {
    %c0_i32 = arith.constant 0 : i32
    %c0_i32_0 = arith.constant 0 : i32
    return %arg0, %c0_i32, %arg1 : i32, i32, i32
  }
}

</mosaic_0001>

<bundles_post_ra>
// kernel: spatiotemporal_attention_full.1
= control target key start
LH: loop header
LB: loop body
LE: loop exit
PB: predicated region body
PF: predicated region fallthrough
CT: control target
= control target key end

     0   :  { %s3283_s30 = smov 0   ;;  %s3285_s10 = smov 0   ;;  %s4192_s0 = inlined_call_operand.vmem [shape: f32[2,16,256], index: 0, kind: input, shape index: {}, may-alias: {0,8}]   ;;  %s4193_s1 = inlined_call_operand.vmem [shape: f32[2,16,256], index: 1, kind: input, shape index: {}, may-alias: {1,9}]   ;;  %s4194_s2 = inlined_call_operand.vmem [shape: f32[16,16], index: 2, kind: input, shape index: {}]   ;;  %s4195_s3 = inlined_call_operand.vmem [shape: f32[16,1], index: 3, kind: input, shape index: {}]   ;;  %s4196_s4 = inlined_call_operand.vmem [shape: f32[16,16], index: 4, kind: input, shape index: {}]   ;;  %s4197_s5 = inlined_call_operand.vmem [shape: f32[16,1], index: 5, kind: input, shape index: {}]   ;;  %s4198_s6 = inlined_call_operand.vmem [shape: f32[16,8], index: 6, kind: input, shape index: {}]   ;;  %s4199_s7 = inlined_call_operand.vmem [shape: f32[16,1], index: 7, kind: input, shape index: {}]   ;;  %s4200_s8 = inlined_call_operand.vmem [shape: f32[2,16,256], index: 8, kind: output, shape index: {0}, may-alias: {0,8}]   ;;  %s4201_s9 = inlined_call_operand.vmem [shape: f32[2,16,256], index: 9, kind: output, shape index: {1}, may-alias: {1,9}]  }
   0x1   :  { %s3287_s11 = smov 0   ;;  %s3289_s12 = smov 0  }
   0x2   :  { %s3291_s13 = smov 0   ;;  %s3293_s14 = smov 0  }
   0x3   :  { %s3295_s15 = smov 0  }
   0x4 LB: > { %s29_s16 = sadd.s32 1, %s3218_s13  ;;  %s32_s17 = sadd.s32 1, %s3222_s14  ;;  %s3226_s15 = sphi %s3295_s15, %s20_s15   ;;  %s3222_s14 = sphi %s3293_s14, %s4214_s14   ;;  %s3218_s13 = sphi %s3291_s13, %s4213_s13   ;;  %s3214_s12 = sphi %s3289_s12, %s4212_s12   ;;  %s3210_s11 = sphi %s3287_s11, %s4211_s11   ;;  %s3206_s10 = sphi %s3285_s10, %s4210_s10   ;;  %s3202_s30 = sphi %s3283_s30, %s4209_s30  }
   0x5   : > { %p30_p0 = scmp.ge.s32.totalorder %s29_s16, 2  ;;  %s2413_s18 = sadd.s32 4294967295, %s3226_s15  }
   0x6   : > { %p229_p1 = scmp.ne.s32.totalorder %s3206_s10, %s3202_s30  ;;  %p230_p2 = scmp.eq.s32.totalorder %s2413_s18, 3 }
   0x7   : > { %s4216_s16 = smov (%p30_p0, %s29_s16), 0  ;;  %s4218_s17 = smov (!%p30_p0, %s32_s17), %s3222_s14 }
   0x8   : > { %4204 = sst [smem:[#allocation10_spill]] %s4216_s16  ;;  %s215_s19 = ssub.s32 %s3218_s13, %s4216_s16 }
   0x9   : > { %p34_p3 = scmp.ge.s32.totalorder %s4218_s17, 2  ;;  %p2417_p4 = scmp.ge.s32.totalorder %s3226_s15, 1 }
   0xa   : > { %p3329_p5 = por %p230_p2, %p229_p1  ;;  %p316_p6 = scmp.lt.s32.totalorder %s3226_s15, 5 }
   0xb   : > { %s4220_s17 = smov (%p34_p3, %s4218_s17), 0  ;;  %s219_s23 = sadd.s32 1, %s3206_s10 }
   0xc   : > { %4206 = sst [smem:[#allocation11_spill]] %s4220_s17  ;;  %p317_p7 = pnand %p2417_p4, %p316_p6 }
   0xd   : > { %s214_s21 = ssub.s32 %s3222_s14, %s4220_s17  ;;  %s351_s25 = sand.u32 (!%p317_p7), 1, %s3202_s30  }
   0xe   : > { %s216_s22 = sor.u32 %s215_s19, %s214_s21  ;;  %320 = sbr.rel (%p317_p7) target bundleno = 2589 (0xa1d), region = 52 }
   0xf   : > { %p217_p8 = scmp.eq.s32.totalorder %s216_s22, 0  ;;  %p360_p9 = scmp.lt.s32.totalorder (!%p317_p7), %s3214_s12, 1 }
  0x10   : > { %s2418_s26 = sshll.u32 (!%p317_p7), %s351_s25, 4  ;;  %p2424_p10 = scmp.ne.s32.totalorder (!%p317_p7), %s3210_s11, 0 }
  0x11   : > { %s3340_s24 = scalar_select %p217_p8, %s3206_s10, %s219_s23  }
  0x12   : > { %s3355_s22 = scalar_lea.vmem (!%p317_p7), [#allocation8], %s2418_s26  ;;  %s3357_s23 = scalar_lea.vmem (!%p317_p7), [#allocation9], %s2418_s26 }
  0x15   : > { %s361_s27 = scalar_select %p360_p9, %s3214_s12, 1 }
  0x16   : > { %374 = sbr.rel (%p2424_p10) target bundleno = 1262 (0x4ee), region = 56  ;;  %v3228_v7 = vmov (!%p2424_p10), 0.0   ;;  %v3229_v12 = vmov (!%p2424_p10), 0   ;;  %v385_v14 = vld [vmem:[%s4195_s3] sm:$0xff] (!%p2424_p10)  ;;  %vm397_vm0 = vcmask (!%p2424_p10), 130048   ;;  %v384_v18 = vld [vmem:[%s4194_s2 + $0x8] sm:$0xff] (!%p2424_p10) }
  0x17   : > { %s2488_s28 = sshll.u32 %s361_s27, 5  ;;  %468 = vmatprep.mubr.f32.mxu0 (!%p2424_p10), %v3228_v7  ;;  %565 = vmatprep.mubr.f32.mxu1 (!%p2424_p10), %v3228_v7  ;;  %v383_v15 = vld [vmem:[%s4194_s2] sm:$0xff] (!%p2424_p10)  ;;  %v482_v19 = vld [vmem:[%s4196_s4 + $0x8] sm:$0xff] (!%p2424_p10)  ;;  %vm846_vm1 = vcmask (!%p2424_p10), 64512   ;;  %vm875_vm2 = vcmask (!%p2424_p10), 1043456  }
  0x18   : > { %s3348_s16 = scalar_lea.vmem %s4192_s0, %s2488_s28  ;;  %s3353_s21 = scalar_lea.vmem %s4193_s1, %s2488_s28  ;;  %2861 = vset.pattern.permute.xlu0 (!%p2424_p10), %v3229_v12  ;;  %v481_v16 = vld [vmem:[%s4196_s4] sm:$0xff] (!%p2424_p10)  ;;  %v484_v58 = vld [vmem:[%s4197_s5 + $0x8] sm:$0xff] (!%p2424_p10) }
  0x19   : > { %v376_v0 = vld [vmem:[%s3348_s16 + $0x8] sm:$0xff] (!%p2424_p10)  ;;  %v378_v1 = vld [vmem:[%s3348_s16 + $0x18] sm:$0xff] (!%p2424_p10)  ;;  %v375_v5 = vld [vmem:[%s3348_s16] sm:$0xff] (!%p2424_p10)  ;;  %389 = vperm.xlu0 (!%p2424_p10), %2861, %v385_v14  }
  0x1a   : > { %v380_v2 = vld [vmem:[%s3353_s21 + $0x8] sm:$0xff] (!%p2424_p10)  ;;  %v2726_v3 = vpack.c.bf16 (!%p2424_p10), %v378_v1, %v376_v0  ;;  %v382_v4 = vld [vmem:[%s3353_s21 + $0x18] sm:$0xff] (!%p2424_p10)  ;;  %v377_v6 = vld [vmem:[%s3348_s16 + $0x10] sm:$0xff] (!%p2424_p10) }
  0x1b   : > { %v2730_v8 = vpack.c.bf16 (!%p2424_p10), %v382_v4, %v380_v2  ;;  %v2728_v9 = vpack.c.bf16 (!%p2424_p10), %v377_v6, %v375_v5  ;;  %v379_v10 = vld [vmem:[%s3353_s21] sm:$0xff] (!%p2424_p10)  ;;  %v381_v11 = vld [vmem:[%s3353_s21 + $0x10] sm:$0xff] (!%p2424_p10) }
  0x1c   : > { %2727 = vmatprep.subr.bf16.mxu0 (!%p2424_p10), %v2726_v3  ;;  %v2732_v13 = vpack.c.bf16 (!%p2424_p10), %v381_v11, %v379_v10  ;;  %v483_v17 = vld [vmem:[%s4197_s5] sm:$0xff] (!%p2424_p10) }
  0x1d   : > { %2731 = vmatprep.subr.bf16.mxu1 %v2730_v8  ;;  %2729 = vmatpush1.bf16.msra.mxu0 %v2728_v9 }
  0x1e   : > { %2733 = vmatpush1.bf16.msra.mxu1 %v2732_v13  ;;  %487 = vperm.xlu0 %2861, %v483_v17  }
  0x20   : > { %2425 = vmatmul.mubr.msk.f32.vlgmr.msra.gmra.mrb[0].mxu0 %vm397_vm0, %v383_v15 }
  0x21   : > { %2427 = vmatmul.mubr.msk.f32.vlgmr.msra.gmra.mrb[0].mxu1 %vm397_vm0, %v481_v16  ;;  %474 = vmatprep.mubr.f32.mxu0 %v3228_v7 }
  0x22   : > { %571 = vmatprep.mubr.f32.mxu1 %v3228_v7 }
  0x24   : > { %2426 = vmatmul.mubr.msk.f32.gmra.mrb[2].mxu0 %vm397_vm0, %v384_v18 }
  0x25   : > { %2428 = vmatmul.mubr.msk.f32.gmra.mrb[2].mxu1 %vm397_vm0, %v482_v19 }
  0x98   : > { %v390_v20 = vpop.permute.xlu0 %389 }
  0x9d   : > { %v488_v21 = vpop.permute.xlu0 %487 }
  0xf3   : > { %v470_v22 = vpop.f32.mrb[0].mxu0 }
  0xf4   : > { %v3387_v23 = vadd.f32 %v470_v22, %v390_v20  ;;  %v567_v24 = vpop.f32.mrb[0].mxu1  ;;  %v472_v25 = vpop.f32.mrb[1].mxu0 }
  0xf5   : > { %v3389_v26 = vadd.f32 %v567_v24, %v488_v21  ;;  %v473_v27 = vadd.f32 %v472_v25, %v390_v20  ;;  %v569_v28 = vpop.f32.mrb[1].mxu1 }
  0xf6   : > { %v570_v29 = vadd.f32 %v569_v28, %v488_v21 }
  0xf7   : > { %v2490_v30 = vpack.c.bf16 %v473_v27, %v3387_v23  ;;  %770 = vmatprep.mubr.f32.mxu0 %v473_v27  ;;  %v2944_v33 = vpack.i.bf16 %v3389_v26, %v3387_v23  ;;  %v3396_v38 = vpop.f32.mrb[2].mxu0 }
  0xf8   : > { %v2491_v31 = vpack.c.bf16 %v570_v29, %v3389_v26  ;;  %840 = vmatprep.mubr.f32.mxu1 %v570_v29  ;;  %v2862_v32 = vpack.i.bf16 %v570_v29, %v473_v27  ;;  %v3398_v41 = vpop.f32.mrb[3].mxu0  ;;  %v3400_v42 = vpop.f32.mrb[2].mxu1 }
  0xf9   : > { %984 = vst [vmem:[#allocation2] sm:$0xff] %v2490_v30  ;;  %v3402_v43 = vpop.f32.mrb[3].mxu1 }
  0xfa   : > { %993 = vst [vmem:[#allocation3] sm:$0xff] %v2491_v31  ;;  %2863 = vxpose.xlu1.b32.start.end [1/1] (short) %v2862_v32, 128 }
 0x137   : > { %2945 = vxpose.xlu1.b32.start.end [1/1] (short) %v2944_v33, 128 }
 0x155   : > { %3026 = vset.pattern.permute.xlu1 %v3229_v12 }
 0x17a   : > { %v2864_v34 = vpop.trf.xlu1 }
 0x17b   : > { %v2868_v35 = vunpack.i.h.bf16 %v2864_v34  ;;  %v2865_v36 = vunpack.i.l.bf16 %v2864_v34 }
 0x17e   : > { %v2869_v37 = vpop.trf.xlu1 }
 0x17f   : > { %v2873_v39 = vunpack.i.h.bf16 %v2869_v37  ;;  %v2870_v40 = vunpack.i.l.bf16 %v2869_v37 }
 0x181   : > { %v2734_v44 = vpack.c.bf16 %v2873_v39, %v2868_v35  ;;  %v2766_v45 = vpack.c.bf16 %v2870_v40, %v2865_v36 }
 0x182   : > { %v2874_v46 = vpop.trf.xlu1 }
 0x183   : > { %2735 = vmatprep.subr.bf16.mxu0 %v2734_v44  ;;  %1050 = vst.msk [vmem:[#allocation5 + $0x40] sm:$0xff] %vm846_vm1, %v2734_v44  ;;  %2767 = vmatprep.subr.bf16.mxu1 %v2766_v45  ;;  %1018 = vst.msk [vmem:[#allocation4 + $0x40] sm:$0xff] %vm846_vm1, %v2766_v45  ;;  %v2878_v47 = vunpack.i.h.bf16 %v2874_v46  ;;  %v2875_v48 = vunpack.i.l.bf16 %v2874_v46 }
 0x186   : > { %v2879_v49 = vpop.trf.xlu1 }
 0x187   : > { %v2883_v50 = vunpack.i.h.bf16 %v2879_v49  ;;  %v2880_v51 = vunpack.i.l.bf16 %v2879_v49 }
 0x189   : > { %v3406_v52 = vpack.c.bf16 %v2883_v50, %v2878_v47  ;;  %v3408_v53 = vpack.c.bf16 %v2880_v51, %v2875_v48 }
 0x18a   : > { %v2884_v54 = vpop.trf.xlu1 }
 0x18b   : > { %1051 = vst.msk [vmem:[#allocation5 + $0x48] sm:$0xff] %vm846_vm1, %v3406_v52  ;;  %1019 = vst.msk [vmem:[#allocation4 + $0x48] sm:$0xff] %vm846_vm1, %v3408_v53  ;;  %v2888_v55 = vunpack.i.h.bf16 %v2884_v54  ;;  %v2885_v56 = vunpack.i.l.bf16 %v2884_v54 }
 0x18e   : > { %v2889_v57 = vpop.trf.xlu1 }
 0x18f   : > { %v2893_v59 = vunpack.i.h.bf16 %v2889_v57  ;;  %v2890_v60 = vunpack.i.l.bf16 %v2889_v57 }
 0x191   : > { %v3417_v61 = vpack.c.bf16 %v2893_v59, %v2888_v55  ;;  %v3419_v62 = vpack.c.bf16 %v2890_v60, %v2885_v56  ;;  %492 = vperm.xlu1 %3026, %v484_v58  }
 0x192   : > { %v2894_v63 = vpop.trf.xlu1 }
 0x193   : > { %1052 = vst.msk [vmem:[#allocation5 + $0x50] sm:$0xff] %vm846_vm1, %v3417_v61  ;;  %1020 = vst.msk [vmem:[#allocation4 + $0x50] sm:$0xff] %vm846_vm1, %v3419_v62  ;;  %v2898_v0 = vunpack.i.h.bf16 %v2894_v63  ;;  %v2895_v1 = vunpack.i.l.bf16 %v2894_v63 }
 0x196   : > { %v2899_v2 = vpop.trf.xlu1 }
 0x197   : > { %v2903_v3 = vunpack.i.h.bf16 %v2899_v2  ;;  %v2900_v4 = vunpack.i.l.bf16 %v2899_v2 }
 0x199   : > { %v3425_v5 = vpack.c.bf16 %v2903_v3, %v2898_v0  ;;  %v3427_v6 = vpack.c.bf16 %v2900_v4, %v2895_v1 }
 0x19a   : > { %v2904_v7 = vpop.trf.xlu1 }
 0x19b   : > { %1053 = vst.msk [vmem:[#allocation5 + $0x58] sm:$0xff] %vm846_vm1, %v3425_v5  ;;  %1021 = vst.msk [vmem:[#allocation4 + $0x58] sm:$0xff] %vm846_vm1, %v3427_v6  ;;  %v2908_v8 = vunpack.i.h.bf16 %v2904_v7  ;;  %v2905_v9 = vunpack.i.l.bf16 %v2904_v7 }
 0x19e   : > { %v2909_v10 = vpop.trf.xlu1 }
 0x19f   : > { %v2913_v11 = vunpack.i.h.bf16 %v2909_v10  ;;  %v2910_v13 = vunpack.i.l.bf16 %v2909_v10 }
 0x1a1   : > { %v3433_v14 = vpack.c.bf16 %v2913_v11, %v2908_v8  ;;  %v3435_v15 = vpack.c.bf16 %v2910_v13, %v2905_v9 }
 0x1a2   : > { %v2914_v16 = vpop.trf.xlu1 }
 0x1a3   : > { %1054 = vst.msk [vmem:[#allocation5 + $0x60] sm:$0xff] %vm846_vm1, %v3433_v14  ;;  %1022 = vst.msk [vmem:[#allocation4 + $0x60] sm:$0xff] %vm846_vm1, %v3435_v15  ;;  %v2918_v17 = vunpack.i.h.bf16 %v2914_v16  ;;  %v2915_v18 = vunpack.i.l.bf16 %v2914_v16 }
 0x1a6   : > { %v2919_v19 = vpop.trf.xlu1 }
 0x1a7   : > { %v2923_v20 = vunpack.i.h.bf16 %v2919_v19  ;;  %v2920_v21 = vunpack.i.l.bf16 %v2919_v19 }
 0x1a9   : > { %v3441_v22 = vpack.c.bf16 %v2923_v20, %v2918_v17  ;;  %v3443_v24 = vpack.c.bf16 %v2920_v21, %v2915_v18 }
 0x1aa   : > { %v2924_v25 = vpop.trf.xlu1 }
 0x1ab   : > { %1055 = vst.msk [vmem:[#allocation5 + $0x68] sm:$0xff] %vm846_vm1, %v3441_v22  ;;  %1023 = vst.msk [vmem:[#allocation4 + $0x68] sm:$0xff] %vm846_vm1, %v3443_v24  ;;  %v2928_v27 = vunpack.i.h.bf16 %v2924_v25  ;;  %v2925_v28 = vunpack.i.l.bf16 %v2924_v25 }
 0x1ae   : > { %v2929_v29 = vpop.trf.xlu1 }
 0x1af   : > { %v2933_v30 = vunpack.i.h.bf16 %v2929_v29  ;;  %v2930_v31 = vunpack.i.l.bf16 %v2929_v29 }
 0x1b1   : > { %v3449_v32 = vpack.c.bf16 %v2933_v30, %v2928_v27  ;;  %v3451_v33 = vpack.c.bf16 %v2930_v31, %v2925_v28 }
 0x1b2   : > { %v2934_v34 = vpop.trf.xlu1 }
 0x1b3   : > { %1056 = vst.msk [vmem:[#allocation5 + $0x70] sm:$0xff] %vm846_vm1, %v3449_v32  ;;  %1024 = vst.msk [vmem:[#allocation4 + $0x70] sm:$0xff] %vm846_vm1, %v3451_v33  ;;  %v2938_v35 = vunpack.i.h.bf16 %v2934_v34  ;;  %v2935_v36 = vunpack.i.l.bf16 %v2934_v34 }
 0x1b6   : > { %v2939_v37 = vpop.trf.xlu1 }
 0x1b7   : > { %v2943_v39 = vunpack.i.h.bf16 %v2939_v37  ;;  %v2940_v40 = vunpack.i.l.bf16 %v2939_v37 }
 0x1b9   : > { %v3457_v44 = vpack.c.bf16 %v2943_v39, %v2938_v35  ;;  %v3459_v45 = vpack.c.bf16 %v2940_v40, %v2935_v36 }
 0x1ba   : > { %v2946_v46 = vpop.trf.xlu1 }
 0x1bb   : > { %1057 = vst.msk [vmem:[#allocation5 + $0x78] sm:$0xff] %vm846_vm1, %v3457_v44  ;;  %1025 = vst.msk [vmem:[#allocation4 + $0x78] sm:$0xff] %vm846_vm1, %v3459_v45  ;;  %v2950_v47 = vunpack.i.h.bf16 %v2946_v46  ;;  %v2947_v48 = vunpack.i.l.bf16 %v2946_v46 }
 0x1be   : > { %v2951_v49 = vpop.trf.xlu1 }
 0x1bf   : > { %v2955_v50 = vunpack.i.h.bf16 %v2951_v49  ;;  %v2952_v51 = vunpack.i.l.bf16 %v2951_v49 }
 0x1c1   : > { %v2736_v54 = vpack.c.bf16 %v2955_v50, %v2950_v47  ;;  %v2768_v55 = vpack.c.bf16 %v2952_v51, %v2947_v48 }
 0x1c2   : > { %v2956_v56 = vpop.trf.xlu1 }
 0x1c3   : > { %2737 = vmatpush3.bf16.msra.mxu0 %v2736_v54  ;;  %1042 = vst.msk [vmem:[#allocation5] sm:$0xff] %vm846_vm1, %v2736_v54  ;;  %2769 = vmatpush3.bf16.msra.mxu1 %v2768_v55  ;;  %1010 = vst.msk [vmem:[#allocation4] sm:$0xff] %vm846_vm1, %v2768_v55  ;;  %v2960_v57 = vunpack.i.h.bf16 %v2956_v56  ;;  %v2957_v58 = vunpack.i.l.bf16 %v2956_v56 }
 0x1c4   : > { %2739 = vmatprep.subr.bf16.mxu0 %v3406_v52  ;;  %2771 = vmatprep.subr.bf16.mxu1 %v3408_v53 }
 0x1c6   : > { %v2961_v59 = vpop.trf.xlu1 }
 0x1c7   : > { %v2965_v60 = vunpack.i.h.bf16 %v2961_v59  ;;  %v2962_v63 = vunpack.i.l.bf16 %v2961_v59 }
 0x1c9   : > { %v2740_v0 = vpack.c.bf16 %v2965_v60, %v2960_v57  ;;  %v2772_v1 = vpack.c.bf16 %v2962_v63, %v2957_v58 }
 0x1ca   : > { %v2966_v2 = vpop.trf.xlu1 }
 0x1cb   : > { %2741 = vmatpush3.bf16.msra.mxu0 %v2740_v0  ;;  %1043 = vst.msk [vmem:[#allocation5 + $0x8] sm:$0xff] %vm846_vm1, %v2740_v0  ;;  %2773 = vmatpush3.bf16.msra.mxu1 %v2772_v1  ;;  %1011 = vst.msk [vmem:[#allocation4 + $0x8] sm:$0xff] %vm846_vm1, %v2772_v1  ;;  %v2970_v52 = vunpack.i.h.bf16 %v2966_v2  ;;  %v2967_v53 = vunpack.i.l.bf16 %v2966_v2 }
 0x1cc   : > { %2743 = vmatprep.subr.bf16.mxu0 %v3417_v61  ;;  %2775 = vmatprep.subr.bf16.mxu1 %v3419_v62 }
 0x1ce   : > { %v2971_v3 = vpop.trf.xlu1 }
 0x1cf   : > { %v2975_v4 = vunpack.i.h.bf16 %v2971_v3  ;;  %v2972_v7 = vunpack.i.l.bf16 %v2971_v3 }
 0x1d1   : > { %v2744_v8 = vpack.c.bf16 %v2975_v4, %v2970_v52  ;;  %v2776_v9 = vpack.c.bf16 %v2972_v7, %v2967_v53 }
 0x1d2   : > { %v2976_v10 = vpop.trf.xlu1 }
 0x1d3   : > { %2745 = vmatpush3.bf16.msra.mxu0 %v2744_v8  ;;  %1044 = vst.msk [vmem:[#allocation5 + $0x10] sm:$0xff] %vm846_vm1, %v2744_v8  ;;  %2777 = vmatpush3.bf16.msra.mxu1 %v2776_v9  ;;  %1012 = vst.msk [vmem:[#allocation4 + $0x10] sm:$0xff] %vm846_vm1, %v2776_v9  ;;  %v2980_v61 = vunpack.i.h.bf16 %v2976_v10  ;;  %v2977_v62 = vunpack.i.l.bf16 %v2976_v10 }
 0x1d4   : > { %2747 = vmatprep.subr.bf16.mxu0 %v3425_v5  ;;  %2779 = vmatprep.subr.bf16.mxu1 %v3427_v6 }
 0x1d6   : > { %v2981_v11 = vpop.trf.xlu1 }
 0x1d7   : > { %v2985_v13 = vunpack.i.h.bf16 %v2981_v11  ;;  %v2982_v16 = vunpack.i.l.bf16 %v2981_v11 }
 0x1d9   : > { %v2748_v17 = vpack.c.bf16 %v2985_v13, %v2980_v61  ;;  %v2780_v18 = vpack.c.bf16 %v2982_v16, %v2977_v62  ;;  %v386_v62 = vld [vmem:[%s4195_s3 + $0x8] sm:$0xff] }
 0x1da   : > { %v2986_v19 = vpop.trf.xlu1 }
 0x1db   : > { %2749 = vmatpush3.bf16.msra.mxu0 %v2748_v17  ;;  %1045 = vst.msk [vmem:[#allocation5 + $0x18] sm:$0xff] %vm846_vm1, %v2748_v17  ;;  %2781 = vmatpush3.bf16.msra.mxu1 %v2780_v18  ;;  %1013 = vst.msk [vmem:[#allocation4 + $0x18] sm:$0xff] %vm846_vm1, %v2780_v18  ;;  %v2990_v5 = vunpack.i.h.bf16 %v2986_v19  ;;  %v2987_v6 = vunpack.i.l.bf16 %v2986_v19 }
 0x1dc   : > { %2751 = vmatprep.subr.bf16.mxu0 %v3433_v14  ;;  %2783 = vmatprep.subr.bf16.mxu1 %v3435_v15 }
 0x1de   : > { %v2991_v20 = vpop.trf.xlu1 }
 0x1df   : > { %v2995_v21 = vunpack.i.h.bf16 %v2991_v20  ;;  %v2992_v25 = vunpack.i.l.bf16 %v2991_v20 }
 0x1e1   : > { %v2752_v27 = vpack.c.bf16 %v2995_v21, %v2990_v5  ;;  %v2784_v28 = vpack.c.bf16 %v2992_v25, %v2987_v6 }
 0x1e2   : > { %v2996_v29 = vpop.trf.xlu1 }
 0x1e3   : > { %2753 = vmatpush3.bf16.msra.mxu0 %v2752_v27  ;;  %1046 = vst.msk [vmem:[#allocation5 + $0x20] sm:$0xff] %vm846_vm1, %v2752_v27  ;;  %2785 = vmatpush3.bf16.msra.mxu1 %v2784_v28  ;;  %1014 = vst.msk [vmem:[#allocation4 + $0x20] sm:$0xff] %vm846_vm1, %v2784_v28  ;;  %v3000_v14 = vunpack.i.h.bf16 %v2996_v29  ;;  %v2997_v15 = vunpack.i.l.bf16 %v2996_v29 }
 0x1e4   : > { %2755 = vmatprep.subr.bf16.mxu0 %v3441_v22  ;;  %2787 = vmatprep.subr.bf16.mxu1 %v3443_v24 }
 0x1e6   : > { %v3001_v30 = vpop.trf.xlu1 }
 0x1e7   : > { %v3005_v31 = vunpack.i.h.bf16 %v3001_v30  ;;  %v3002_v34 = vunpack.i.l.bf16 %v3001_v30 }
 0x1e9   : > { %v2756_v35 = vpack.c.bf16 %v3005_v31, %v3000_v14  ;;  %v2788_v36 = vpack.c.bf16 %v3002_v34, %v2997_v15 }
 0x1ea   : > { %v3006_v37 = vpop.trf.xlu1 }
 0x1eb   : > { %2757 = vmatpush3.bf16.msra.mxu0 %v2756_v35  ;;  %1047 = vst.msk [vmem:[#allocation5 + $0x28] sm:$0xff] %vm846_vm1, %v2756_v35  ;;  %2789 = vmatpush3.bf16.msra.mxu1 %v2788_v36  ;;  %1015 = vst.msk [vmem:[#allocation4 + $0x28] sm:$0xff] %vm846_vm1, %v2788_v36  ;;  %v3010_v22 = vunpack.i.h.bf16 %v3006_v37  ;;  %v3007_v24 = vunpack.i.l.bf16 %v3006_v37 }
 0x1ec   : > { %2759 = vmatprep.subr.bf16.mxu0 %v3449_v32  ;;  %2791 = vmatprep.subr.bf16.mxu1 %v3451_v33 }
 0x1ee   : > { %v3011_v39 = vpop.trf.xlu1 }
 0x1ef   : > { %v3015_v40 = vunpack.i.h.bf16 %v3011_v39  ;;  %v3012_v46 = vunpack.i.l.bf16 %v3011_v39 }
 0x1f1   : > { %v2760_v47 = vpack.c.bf16 %v3015_v40, %v3010_v22  ;;  %v2792_v48 = vpack.c.bf16 %v3012_v46, %v3007_v24 }
 0x1f2   : > { %v3016_v49 = vpop.trf.xlu1 }
 0x1f3   : > { %2761 = vmatpush3.bf16.msra.mxu0 %v2760_v47  ;;  %1048 = vst.msk [vmem:[#allocation5 + $0x30] sm:$0xff] %vm846_vm1, %v2760_v47  ;;  %2793 = vmatpush3.bf16.msra.mxu1 %v2792_v48  ;;  %1016 = vst.msk [vmem:[#allocation4 + $0x30] sm:$0xff] %vm846_vm1, %v2792_v48  ;;  %v3020_v32 = vunpack.i.h.bf16 %v3016_v49  ;;  %v3017_v33 = vunpack.i.l.bf16 %v3016_v49 }
 0x1f4   : > { %2763 = vmatprep.subr.bf16.mxu0 %v3457_v44  ;;  %2795 = vmatprep.subr.bf16.mxu1 %v3459_v45 }
 0x1f6   : > { %v3021_v50 = vpop.trf.xlu1 }
 0x1f7   : > { %v3025_v51 = vunpack.i.h.bf16 %v3021_v50  ;;  %v3022_v54 = vunpack.i.l.bf16 %v3021_v50 }
 0x1f9   : > { %v2764_v55 = vpack.c.bf16 %v3025_v51, %v3020_v32  ;;  %v2796_v56 = vpack.c.bf16 %v3022_v54, %v3017_v33 }
 0x1fb   : > { %2765 = vmatpush3.bf16.msra.mxu0 %v2764_v55  ;;  %1049 = vst.msk [vmem:[#allocation5 + $0x38] sm:$0xff] %vm846_vm1, %v2764_v55  ;;  %2797 = vmatpush3.bf16.msra.mxu1 %v2796_v56  ;;  %1017 = vst.msk [vmem:[#allocation4 + $0x38] sm:$0xff] %vm846_vm1, %v2796_v56 }
 0x1fe   : > { %771 = vmatmul.mubr.f32.vlgmr.msra.gmra.mrb[4].mxu0 %v3387_v23  ;;  %841 = vmatmul.mubr.f32.vlgmr.msra.gmra.mrb[4].mxu1 %v3389_v26 }
 0x1ff   : > { %967 = vmatprep.mubr.bf16.mxu1 %v3229_v12  ;;  %914 = vmatprep.mubr.bf16.mxu0 %v3229_v12 }
 0x210   : > { %v493_v44 = vpop.permute.xlu1 %492 }
 0x211   : > { %v574_v45 = vadd.f32 %v3400_v42, %v493_v44  ;;  %v576_v57 = vadd.f32 %v3402_v43, %v493_v44 }
 0x213   : > { %v924_v58 = vpack.c.bf16 %v574_v45, %v574_v45  ;;  %v925_v59 = vpack.c.bf16 %v576_v57, %v576_v57 }
 0x215   : > { %v930_v60 = vsel %vm875_vm2, %v924_v58, 0  ;;  %2431 = vmatprep.subr.msk.bf16.mxu1 %vm875_vm2, %v925_v59 }
 0x216   : > { %936 = vmatpush1.bf16.msra.mxu1 %v930_v60 }
 0x2d1   : > { %v2526_v23 = vpop.f32.mrb[4].mxu0  ;;  %v2561_v63 = vpop.f32.mrb[4].mxu1 }
 0x2d2   : > { %v2527_v26 = vpop.f32.mrb[5].mxu0  ;;  %v2562_v0 = vpop.f32.mrb[5].mxu1 }
 0x2d3   : > { %v2528_v1 = vadd.f32 %v2527_v26, %v2526_v23  ;;  %v2563_v2 = vadd.f32 %v2562_v0, %v2561_v63 }
 0x2d5   : > { %v847_v12 = vsel %vm846_vm1, %v2528_v1, -inf  ;;  %v858_v42 = vsel %vm846_vm1, %v2563_v2, -inf }
 0x2d6   : > { %848 = vmax.xlane.f32.xlu0 %v847_v12 }
 0x2da   : > { %859 = vmax.xlane.f32.xlu0 %v858_v42 }
 0x363   : > { %v849_v43 = vpop.xlane.xlu0 %848 }
 0x364   : > { %v850_v52 = vsub.f32 %v2528_v1, %v849_v43 }
 0x366   : > { %v851_v53 = vmul.f32 1.442695, %v850_v52 }
 0x367   : > { %v860_v3 = vpop.xlane.xlu0 %859 }
 0x368   : > { %3027 = vpow2.f32 %v851_v53  ;;  %v861_v4 = vsub.f32 %v2563_v2, %v860_v3 }
 0x36a   : > { %v862_v7 = vmul.f32 1.442695, %v861_v4 }
 0x36c   : > { %3029 = vpow2.f32 %v862_v7 }
 0x372   : > { %v3028_v8 = vpop.eup %3027 }
 0x373   : > { %v853_v9 = vsel %vm846_vm1, %v3028_v8, 0.0 }
 0x374   : > { %854 = vadd.xlane.f32.xlu0 %v853_v9 }
 0x376   : > { %v3030_v10 = vpop.eup %3029 }
 0x377   : > { %v864_v61 = vsel %vm846_vm1, %v3030_v10, 0.0 }
 0x378   : > { %865 = vadd.xlane.f32.xlu0 %v864_v61 }
 0x38e   : > { %394 = vperm.xlu0 %2861, %v386_v62  }
 0x401   : > { %v855_v11 = vpop.xlane.xlu0 %854 }
 0x402   : > { %3031 = vrcp.f32 %v855_v11 }
 0x405   : > { %v866_v13 = vpop.xlane.xlu0 %865 }
 0x406   : > { %3033 = vrcp.f32 %v866_v13 }
 0x40c   : > { %v3032_v16 = vpop.eup %3031 }
 0x40d   : > { %v857_v17 = vmul.f32 %v3032_v16, %v3028_v8  ;;  %v395_v18 = vpop.permute.xlu0 %394 }
 0x40e   : > { %v477_v19 = vadd.f32 %v3396_v38, %v395_v18  ;;  %v479_v5 = vadd.f32 %v3398_v41, %v395_v18 }
 0x40f   : > { %v923_v6 = vpack.c.bf16 %v857_v17, %v857_v17 }
 0x410   : > { %v3034_v20 = vpop.eup %3033  ;;  %v870_v21 = vpack.c.bf16 %v477_v19, %v477_v19  ;;  %v871_v25 = vpack.c.bf16 %v479_v5, %v479_v5 }
 0x411   : > { %v868_v27 = vmul.f32 %v3034_v20, %v3030_v10  ;;  %2432 = vmatmul.mubr.msk.bf16.vlgmr.msra.gmra.mrb[8].mxu1 %vm846_vm1, %v923_v6 }
 0x412   : > { %v877_v28 = vsel %vm875_vm2, %v870_v21, 0  ;;  %2429 = vmatprep.subr.msk.bf16.mxu0 %vm875_vm2, %v871_v25 }
 0x413   : > { %883 = vmatpush1.bf16.msra.mxu0 %v877_v28  ;;  %v869_v29 = vpack.c.bf16 %v868_v27, %v868_v27 }
 0x416   : > { %2430 = vmatmul.mubr.msk.bf16.vlgmr.msra.gmra.mrb[8].mxu0 %vm846_vm1, %v869_v29 }
 0x4e4   : > { %v969_v14 = vpop.f32.mrb[8].mxu1 }
 0x4e5   : > { %v971_v15 = vpop.f32.mrb[9].mxu1 }
 0x4e6   : > { %v2493_v38 = vpack.c.bf16 %v971_v15, %v969_v14  ;;  %v973_v30 = vpop.f32.mrb[10].mxu1 }
 0x4e7   : > { %v974_v41 = vpop.f32.mrb[11].mxu1 }
 0x4e8   : > { %1075 = vst [vmem:[#allocation7] sm:$0xff] %v2493_v38 }
 0x4e9   : > { %v916_v31 = vpop.f32.mrb[8].mxu0 }
 0x4ea   : > { %v918_v34 = vpop.f32.mrb[9].mxu0 }
 0x4eb   : > { %v2492_v35 = vpack.c.bf16 %v918_v34, %v916_v31  ;;  %v920_v36 = vpop.f32.mrb[10].mxu0 }
 0x4ec   : > { %v921_v37 = vpop.f32.mrb[11].mxu0 }
 0x4ed   : > { %1066 = vst [vmem:[#allocation6] sm:$0xff] %v2492_v35 }
 0x4ee PF: > { %s2437_s18 = sshll.u32 %s3210_s11, 7  ;;  %v1093_v22 = vld [vmem:[#allocation4] sm:$0xff]  ;;  %vm1109_vm3 = vcmask 64512   ;;  %vm1158_vm4 = vcmask 1043456   ;;  %v1094_v40 = vld [vmem:[#allocation4 + $0x8] sm:$0xff]  ;;  %v1095_v46 = vld [vmem:[#allocation4 + $0x10] sm:$0xff] }
 0x4ef   : > { %s3517_s19 = sshra.s32 %s2437_s18, 7  ;;  %2648 = vmatprep.mubr.msk.bf16.mxu0 %vm1109_vm3, %v1093_v22  ;;  %v1096_v47 = vld [vmem:[#allocation4 + $0x18] sm:$0xff]  ;;  %v1097_v48 = vld [vmem:[#allocation4 + $0x20] sm:$0xff]  ;;  %v1098_v49 = vld [vmem:[#allocation4 + $0x28] sm:$0xff]  ;;  %vm3231_vm5 = vmmov 0  }
 0x4f0   : > { %s2440_s30 = sshll.u32 %s3517_s19, 2  ;;  %v1099_v32 = vld [vmem:[#allocation4 + $0x30] sm:$0xff]  ;;  %v1100_v33 = vld [vmem:[#allocation4 + $0x38] sm:$0xff]  ;;  %v1101_v50 = vld [vmem:[#allocation4 + $0x40] sm:$0xff]  ;;  %s2438_s26 = sshll.u32 %s3517_s19, 3 }
 0x4f1   : > { %s1088_s17 = scalar_lea.vmem [#allocation3], %s2440_s30  ;;  %v1102_v51 = vld [vmem:[#allocation4 + $0x48] sm:$0xff]  ;;  %v1103_v54 = vld [vmem:[#allocation4 + $0x50] sm:$0xff]  ;;  %v1104_v55 = vld [vmem:[#allocation4 + $0x58] sm:$0xff]  ;;  %s1091_s25 = scalar_lea.vmem [#allocation2], %s2440_s30 }
 0x4f2   : > { %v1089_v24 = vld [vmem:[%s1088_s17] sm:$0xf]  ;;  %v1105_v56 = vld [vmem:[#allocation4 + $0x60] sm:$0xff]  ;;  %v1106_v44 = vld [vmem:[#allocation4 + $0x68] sm:$0xff]  ;;  %s1084_s27 = scalar_lea.vmem %s3353_s21, %s2438_s26  ;;  %s1080_s28 = scalar_lea.vmem %s3348_s16, %s2438_s26 }
 0x4f3   : > { %2798 = vmatprep.subr.msk.bf16.mxu0 %vm1158_vm4, %v1089_v24  ;;  %v1160_v39 = vsel %vm1158_vm4, %v1089_v24, 0  ;;  %v1107_v45 = vld [vmem:[#allocation4 + $0x70] sm:$0xff]  ;;  %v1108_v57 = vld [vmem:[#allocation4 + $0x78] sm:$0xff]  ;;  %s2482_s16 = sshll.u32 (%p3329_p5), %s3214_s12, 2 }
 0x4f4   : > { %2647 = vmatpush3.bf16.msra.mxu0 %v1160_v39  ;;  %s2217_s21 = sadd.s32 (%p3329_p5), %s3210_s11, %s2482_s16 }
 0x4f5   : > { %s2483_s19 = sshll.u32 (%p3329_p5), %s2217_s21, 3 }
 0x4f6   : > { %s2219_s30 = scalar_lea.vmem (%p3329_p5), %s4200_s8, %s2483_s19 }
 0x4f7   : > { %2649 = vmatmul.mubr.msk.bf16.vlgmr.msra.gmra.mrb[0].mxu0 %vm1109_vm3, %v1094_v40 }
 0x4f8   : > { %2652 = vmatprep.mubr.msk.bf16.mxu0 %vm1109_vm3, %v1095_v46 }
 0x4ff   : > { %2653 = vmatmul.mubr.msk.bf16.gmra.mrb[4].mxu0 %vm1109_vm3, %v1096_v47 }
 0x500   : > { %2656 = vmatprep.mubr.msk.bf16.mxu0 %vm1109_vm3, %v1097_v48 }
 0x507   : > { %2657 = vmatmul.mubr.msk.bf16.gmra.mrb[8].mxu0 %vm1109_vm3, %v1098_v49 }
 0x508   : > { %2660 = vmatprep.mubr.msk.bf16.mxu0 %vm1109_vm3, %v1099_v32 }
 0x50f   : > { %2661 = vmatmul.mubr.msk.bf16.gmra.mrb[12].mxu0 %vm1109_vm3, %v1100_v33 }
 0x510   : > { %2664 = vmatprep.mubr.msk.bf16.mxu0 %vm1109_vm3, %v1101_v50 }
 0x517   : > { %2665 = vmatmul.mubr.msk.bf16.gmra.mrb[16].mxu0 %vm1109_vm3, %v1102_v51 }
 0x518   : > { %2668 = vmatprep.mubr.msk.bf16.mxu0 %vm1109_vm3, %v1103_v54 }
 0x51f   : > { %2669 = vmatmul.mubr.msk.bf16.gmra.mrb[20].mxu0 %vm1109_vm3, %v1104_v55 }
 0x520   : > { %2672 = vmatprep.mubr.msk.bf16.mxu0 %vm1109_vm3, %v1105_v56 }
 0x527   : > { %2673 = vmatmul.mubr.msk.bf16.gmra.mrb[24].mxu0 %vm1109_vm3, %v1106_v44 }
 0x528   : > { %2676 = vmatprep.mubr.msk.bf16.mxu0 %vm1109_vm3, %v1107_v45 }
 0x52f   : > { %2677 = vmatmul.mubr.msk.bf16.gmra.mrb[28].mxu0 %vm1109_vm3, %v1108_v57 }
 0x5ca   : > { %v3540_v58 = vpop.f32.mrb[0].mxu0 }
 0x5cb   : > { %v3542_v59 = vpop.f32.mrb[1].mxu0 }
 0x5cc   : > { %v3544_v60 = vpop.f32.mrb[2].mxu0 }
 0x5cd   : > { %v3546_v23 = vpop.f32.mrb[3].mxu0 }
 0x5d2   : > { %v3548_v63 = vpop.f32.mrb[4].mxu0 }
 0x5d3   : > { %v1325_v26 = vmax.f32 %v3540_v58, %v3548_v63  ;;  %v3552_v0 = vpop.f32.mrb[5].mxu0 }
 0x5d4   : > { %v1323_v1 = vmax.f32 %v3542_v59, %v3552_v0  ;;  %v3556_v2 = vpop.f32.mrb[6].mxu0 }
 0x5d5   : > { %v1326_v12 = vmax.f32 %v3544_v60, %v3556_v2  ;;  %v3560_v42 = vpop.f32.mrb[7].mxu0 }
 0x5d6   : > { %v1324_v43 = vmax.f32 %v3546_v23, %v3560_v42 }
 0x5da   : > { %v3564_v52 = vpop.f32.mrb[8].mxu0 }
 0x5db   : > { %v1329_v53 = vmax.f32 %v1325_v26, %v3564_v52  ;;  %v3567_v3 = vpop.f32.mrb[9].mxu0 }
 0x5dc   : > { %v1327_v4 = vmax.f32 %v1323_v1, %v3567_v3  ;;  %v3570_v7 = vpop.f32.mrb[10].mxu0 }
 0x5dd   : > { %v1330_v8 = vmax.f32 %v1326_v12, %v3570_v7  ;;  %v3573_v9 = vpop.f32.mrb[11].mxu0 }
 0x5de   : > { %v1328_v10 = vmax.f32 %v1324_v43, %v3573_v9 }
 0x5e2   : > { %v3576_v61 = vpop.f32.mrb[12].mxu0 }
 0x5e3   : > { %v1333_v62 = vmax.f32 %v1329_v53, %v3576_v61  ;;  %v3579_v11 = vpop.f32.mrb[13].mxu0 }
 0x5e4   : > { %v1331_v13 = vmax.f32 %v1327_v4, %v3579_v11  ;;  %v3582_v16 = vpop.f32.mrb[14].mxu0 }
 0x5e5   : > { %v1334_v17 = vmax.f32 %v1330_v8, %v3582_v16  ;;  %v3585_v18 = vpop.f32.mrb[15].mxu0 }
 0x5e6   : > { %v1332_v19 = vmax.f32 %v1328_v10, %v3585_v18 }
 0x5ea   : > { %v3588_v5 = vpop.f32.mrb[16].mxu0 }
 0x5eb   : > { %v1337_v6 = vmax.f32 %v1333_v62, %v3588_v5  ;;  %v3591_v20 = vpop.f32.mrb[17].mxu0 }
 0x5ec   : > { %v1335_v21 = vmax.f32 %v1331_v13, %v3591_v20  ;;  %v3594_v25 = vpop.f32.mrb[18].mxu0 }
 0x5ed   : > { %v1338_v27 = vmax.f32 %v1334_v17, %v3594_v25  ;;  %v3597_v28 = vpop.f32.mrb[19].mxu0 }
 0x5ee   : > { %v1336_v29 = vmax.f32 %v1332_v19, %v3597_v28 }
 0x5f2   : > { %v3600_v14 = vpop.f32.mrb[20].mxu0 }
 0x5f3   : > { %v1341_v15 = vmax.f32 %v1337_v6, %v3600_v14  ;;  %v3603_v38 = vpop.f32.mrb[21].mxu0 }
 0x5f4   : > { %v1339_v30 = vmax.f32 %v1335_v21, %v3603_v38  ;;  %v3606_v41 = vpop.f32.mrb[22].mxu0 }
 0x5f5   : > { %v1342_v31 = vmax.f32 %v1338_v27, %v3606_v41  ;;  %v3609_v34 = vpop.f32.mrb[23].mxu0 }
 0x5f6   : > { %v1340_v35 = vmax.f32 %v1336_v29, %v3609_v34 }
 0x5fa   : > { %v3612_v36 = vpop.f32.mrb[24].mxu0 }
 0x5fb   : > { %v1345_v37 = vmax.f32 %v1341_v15, %v3612_v36  ;;  %v3615_v22 = vpop.f32.mrb[25].mxu0 }
 0x5fc   : > { %v1343_v24 = vmax.f32 %v1339_v30, %v3615_v22  ;;  %v3618_v39 = vpop.f32.mrb[26].mxu0 }
 0x5fd   : > { %v1346_v40 = vmax.f32 %v1342_v31, %v3618_v39  ;;  %v3621_v46 = vpop.f32.mrb[27].mxu0 }
 0x5fe   : > { %v1344_v47 = vmax.f32 %v1340_v35, %v3621_v46 }
 0x602   : > { %v3624_v48 = vpop.f32.mrb[28].mxu0 }
 0x603   : > { %v1349_v49 = vmax.f32 %v1345_v37, %v3624_v48  ;;  %v3627_v32 = vpop.f32.mrb[29].mxu0 }
 0x604   : > { %v1347_v33 = vmax.f32 %v1343_v24, %v3627_v32  ;;  %v3630_v50 = vpop.f32.mrb[30].mxu0 }
 0x605   : > { %v1350_v51 = vmax.f32 %v1346_v40, %v3630_v50  ;;  %v3633_v54 = vpop.f32.mrb[31].mxu0 }
 0x606   : > { %v1348_v55 = vmax.f32 %v1344_v47, %v3633_v54 }
 0x607   : > { %v1352_v56 = vmax.f32 %v1349_v49, %v1350_v51 }
 0x608   : > { %v1351_v44 = vmax.f32 %v1347_v33, %v1348_v55 }
 0x60a   : > { %v1353_v45 = vmax.f32 %v1351_v44, %v1352_v56  ;;  %v3702_v44 = vld [vmem:[#allocation6] sm:$0xff] }
 0x60c   : > { %v1354_v57 = vrot.slane %v1353_v45, 4 }
 0x60e   : > { %v1355_v26 = vmax.f32 %v1353_v45, %v1354_v57  ;;  %v2459_v57 = vcombine.high %v3702_v44, %v3702_v44 }
 0x610   : > { %v1356_v1 = vrot.slane %v1355_v26, 2  ;;  %1582 = vmatprep.mubr.bf16.mxu1 %v2459_v57 }
 0x612   : > { %v1357_v12 = vmax.f32 %v1355_v26, %v1356_v1 }
 0x614   : > { %v1358_v43 = vrot.slane %v1357_v12, 1 }
 0x616   : > { %v3636_v53 = vmax.f32 %v1357_v12, %v1358_v43 }
 0x618   : > { %v1360_v4 = vsub.f32 %v3542_v59, %v3636_v53  ;;  %v1361_v8 = vsub.f32 %v3546_v23, %v3636_v53  ;;  %v1362_v10 = vsub.f32 %v3540_v58, %v3636_v53  ;;  %v1363_v62 = vsub.f32 %v3544_v60, %v3636_v53 }
 0x619   : > { %v1364_v13 = vsub.f32 %v3552_v0, %v3636_v53  ;;  %v1365_v17 = vsub.f32 %v3560_v42, %v3636_v53  ;;  %v1366_v19 = vsub.f32 %v3548_v63, %v3636_v53  ;;  %v1367_v59 = vsub.f32 %v3556_v2, %v3636_v53 }
 0x61a   : > { %v1368_v23 = vsub.f32 %v3567_v3, %v3636_v53  ;;  %v1369_v58 = vsub.f32 %v3573_v9, %v3636_v53  ;;  %v1370_v60 = vsub.f32 %v3564_v52, %v3636_v53  ;;  %v1371_v0 = vsub.f32 %v3570_v7, %v3636_v53 }
 0x61b   : > { %v1372_v42 = vsub.f32 %v3579_v11, %v3636_v53  ;;  %v1373_v63 = vsub.f32 %v3585_v18, %v3636_v53  ;;  %v1374_v2 = vsub.f32 %v3576_v61, %v3636_v53  ;;  %v1375_v3 = vsub.f32 %v3582_v16, %v3636_v53 }
 0x61c   : > { %v1376_v9 = vsub.f32 %v3591_v20, %v3636_v53  ;;  %v1377_v52 = vsub.f32 %v3597_v28, %v3636_v53  ;;  %v1378_v7 = vsub.f32 %v3588_v5, %v3636_v53  ;;  %v1379_v11 = vsub.f32 %v3594_v25, %v3636_v53 }
 0x61d   : > { %v1380_v18 = vsub.f32 %v3603_v38, %v3636_v53  ;;  %v1381_v61 = vsub.f32 %v3609_v34, %v3636_v53  ;;  %v1382_v6 = vsub.f32 %v3600_v14, %v3636_v53  ;;  %v1383_v21 = vsub.f32 %v3606_v41, %v3636_v53 }
 0x61e   : > { %v1384_v27 = vsub.f32 %v3615_v22, %v3636_v53  ;;  %v1385_v29 = vsub.f32 %v3621_v46, %v3636_v53  ;;  %v1386_v15 = vsub.f32 %v3612_v36, %v3636_v53  ;;  %v1387_v30 = vsub.f32 %v3618_v39, %v3636_v53 }
 0x61f   : > { %v1388_v31 = vsub.f32 %v3627_v32, %v3636_v53  ;;  %v1389_v35 = vsub.f32 %v3633_v54, %v3636_v53  ;;  %v1390_v37 = vsub.f32 %v3624_v48, %v3636_v53  ;;  %v1391_v24 = vsub.f32 %v3630_v50, %v3636_v53 }
 0x620   : > { %v1392_v40 = vmul.f32 1.442695, %v1360_v4  ;;  %v1394_v47 = vmul.f32 1.442695, %v1361_v8  ;;  %v1396_v49 = vmul.f32 1.442695, %v1362_v10 }
 0x621   : > { %v1398_v33 = vmul.f32 1.442695, %v1363_v62  ;;  %v1400_v51 = vmul.f32 1.442695, %v1364_v13  ;;  %v1402_v55 = vmul.f32 1.442695, %v1365_v17 }
 0x622   : > { %3040 = vpow2.f32 %v1392_v40  ;;  %v1404_v56 = vmul.f32 1.442695, %v1366_v19  ;;  %v1406_v45 = vmul.f32 1.442695, %v1367_v59  ;;  %v1408_v12 = vmul.f32 1.442695, %v1368_v23 }
 0x623   : > { %3042 = vpow2.f32 %v1394_v47  ;;  %v1410_v8 = vmul.f32 1.442695, %v1369_v58  ;;  %v1412_v13 = vmul.f32 1.442695, %v1370_v60  ;;  %v1414_v59 = vmul.f32 1.442695, %v1371_v0 }
 0x624   : > { %3044 = vpow2.f32 %v1396_v49  ;;  %v1416_v47 = vmul.f32 1.442695, %v1372_v42  ;;  %v1422_v42 = vmul.f32 1.442695, %v1375_v3  ;;  %v1442_v14 = vmul.f32 1.442695, %v1385_v29 }
 0x625   : > { %3046 = vpow2.f32 %v1398_v33  ;;  %v1418_v33 = vmul.f32 1.442695, %v1373_v63  ;;  %v1424_v63 = vmul.f32 1.442695, %v1376_v9  ;;  %v1444_v41 = vmul.f32 1.442695, %v1386_v15 }
 0x626   : > { %3048 = vpow2.f32 %v1400_v51  ;;  %v1446_v22 = vmul.f32 1.442695, %v1387_v30  ;;  %v1448_v46 = vmul.f32 1.442695, %v1388_v31  ;;  %v1450_v36 = vmul.f32 1.442695, %v1389_v35 }
 0x627   : > { %3050 = vpow2.f32 %v1402_v55  ;;  %v1420_v55 = vmul.f32 1.442695, %v1374_v2  ;;  %v1452_v39 = vmul.f32 1.442695, %v1390_v37  ;;  %v1454_v32 = vmul.f32 1.442695, %v1391_v24 }
 0x628   : > { %3052 = vpow2.f32 %v1404_v56 }
 0x629   : > { %3054 = vpow2.f32 %v1406_v45 }
 0x62a   : > { %3056 = vpow2.f32 %v1408_v12 }
 0x62b   : > { %3058 = vpow2.f32 %v1410_v8  ;;  %v1428_v8 = vmul.f32 1.442695, %v1378_v7 }
 0x62c   : > { %v3706_v26 = vpop.eup %3040  ;;  %3060 = vpow2.f32 %v1412_v13  ;;  %v1432_v13 = vmul.f32 1.442695, %v1380_v18 }
 0x62d   : > { %v3708_v1 = vpop.eup %3042  ;;  %3062 = vpow2.f32 %v1414_v59  ;;  %v1436_v59 = vmul.f32 1.442695, %v1382_v6 }
 0x62e   : > { %v1456_v43 = vadd.f32 %v3708_v1, %v3706_v26  ;;  %v3712_v4 = vpop.eup %3044  ;;  %3064 = vpow2.f32 %v1416_v47 }
 0x62f   : > { %v3715_v62 = vpop.eup %3046  ;;  %3066 = vpow2.f32 %v1418_v33 }
 0x630   : > { %v1457_v10 = vadd.f32 %v3712_v4, %v1456_v43  ;;  %v3718_v19 = vpop.eup %3048  ;;  %3068 = vpow2.f32 %v1420_v55  ;;  %v1426_v43 = vmul.f32 1.442695, %v1377_v52 }
 0x631   : > { %v3721_v40 = vpop.eup %3050  ;;  %3070 = vpow2.f32 %v1422_v42 }
 0x632   : > { %v1458_v17 = vadd.f32 %v3715_v62, %v1457_v10  ;;  %v3724_v49 = vpop.eup %3052  ;;  %3072 = vpow2.f32 %v1424_v63  ;;  %v1430_v10 = vmul.f32 1.442695, %v1379_v11 }
 0x633   : > { %v3727_v51 = vpop.eup %3054  ;;  %3074 = vpow2.f32 %v1426_v43 }
 0x634   : > { %v1459_v23 = vadd.f32 %v3718_v19, %v1458_v17  ;;  %v3730_v56 = vpop.eup %3056  ;;  %3076 = vpow2.f32 %v1428_v8  ;;  %v1434_v17 = vmul.f32 1.442695, %v1381_v61  ;;  %v1440_v61 = vmul.f32 1.442695, %v1384_v27 }
 0x635   : > { %v3736_v57 = vpop.eup %3058  ;;  %3078 = vpow2.f32 %v1430_v10 }
 0x636   : > { %v1460_v58 = vadd.f32 %v3721_v40, %v1459_v23  ;;  %v3742_v12 = vpop.eup %3060  ;;  %3080 = vpow2.f32 %v1432_v13  ;;  %v1438_v23 = vmul.f32 1.442695, %v1383_v21 }
 0x637   : > { %v3748_v3 = vpop.eup %3062  ;;  %3082 = vpow2.f32 %v1434_v17 }
 0x638   : > { %v1461_v60 = vadd.f32 %v3724_v49, %v1460_v58  ;;  %v3754_v9 = vpop.eup %3064  ;;  %3084 = vpow2.f32 %v1436_v59 }
 0x639   : > { %v3760_v52 = vpop.eup %3066  ;;  %3086 = vpow2.f32 %v1438_v23 }
 0x63a   : > { %v1462_v0 = vadd.f32 %v3727_v51, %v1461_v60  ;;  %v3766_v7 = vpop.eup %3068  ;;  %3088 = vpow2.f32 %v1440_v61 }
 0x63b   : > { %v3772_v11 = vpop.eup %3070  ;;  %3090 = vpow2.f32 %v1442_v14 }
 0x63c   : > { %v1463_v45 = vadd.f32 %v3730_v56, %v1462_v0  ;;  %v3073_v18 = vpop.eup %3072  ;;  %3092 = vpow2.f32 %v1444_v41 }
 0x63d   : > { %v3075_v34 = vpop.eup %3074  ;;  %3094 = vpow2.f32 %v1446_v22 }
 0x63e   : > { %v1464_v2 = vadd.f32 %v3736_v57, %v1463_v45  ;;  %v3077_v33 = vpop.eup %3076  ;;  %3096 = vpow2.f32 %v1448_v46 }
 0x63f   : > { %v3079_v60 = vpop.eup %3078  ;;  %3098 = vpow2.f32 %v1450_v36 }
 0x640   : > { %v1465_v16 = vadd.f32 %v3742_v12, %v1464_v2  ;;  %v3081_v55 = vpop.eup %3080  ;;  %3100 = vpow2.f32 %v1452_v39 }
 0x641   : > { %v3083_v0 = vpop.eup %3082  ;;  %3102 = vpow2.f32 %v1454_v32 }
 0x642   : > { %v1466_v20 = vadd.f32 %v3748_v3, %v1465_v16  ;;  %v3085_v42 = vpop.eup %3084 }
 0x643   : > { %v3087_v45 = vpop.eup %3086 }
 0x644   : > { %v1467_v28 = vadd.f32 %v3754_v9, %v1466_v20  ;;  %v3089_v63 = vpop.eup %3088 }
 0x645   : > { %v3091_v2 = vpop.eup %3090 }
 0x646   : > { %v1468_v5 = vadd.f32 %v3760_v52, %v1467_v28  ;;  %v3093_v54 = vpop.eup %3092 }
 0x647   : > { %v3095_v16 = vpop.eup %3094 }
 0x648   : > { %v1469_v25 = vadd.f32 %v3766_v7, %v1468_v5  ;;  %v3097_v20 = vpop.eup %3096 }
 0x649   : > { %v3099_v48 = vpop.eup %3098 }
 0x64a   : > { %v1470_v38 = vadd.f32 %v3772_v11, %v1469_v25  ;;  %v3101_v28 = vpop.eup %3100 }
 0x64b   : > { %v3103_v5 = vpop.eup %3102 }
 0x64c   : > { %v1471_v47 = vadd.f32 %v3073_v18, %v1470_v38 }
 0x64e   : > { %v1472_v58 = vadd.f32 %v3075_v34, %v1471_v47 }
 0x650   : > { %v1473_v6 = vadd.f32 %v3077_v33, %v1472_v58 }
 0x652   : > { %v1474_v21 = vadd.f32 %v3079_v60, %v1473_v6 }
 0x654   : > { %v1475_v27 = vadd.f32 %v3081_v55, %v1474_v21 }
 0x656   : > { %v1476_v29 = vadd.f32 %v3083_v0, %v1475_v27 }
 0x658   : > { %v1477_v15 = vadd.f32 %v3085_v42, %v1476_v29 }
 0x65a   : > { %v1478_v30 = vadd.f32 %v3087_v45, %v1477_v15 }
 0x65c   : > { %v1479_v31 = vadd.f32 %v3089_v63, %v1478_v30 }
 0x65e   : > { %v1480_v43 = vadd.f32 %v3091_v2, %v1479_v31 }
 0x660   : > { %v1481_v35 = vadd.f32 %v3093_v54, %v1480_v43 }
 0x662   : > { %v1482_v8 = vadd.f32 %v3095_v16, %v1481_v35 }
 0x664   : > { %v1483_v10 = vadd.f32 %v3097_v20, %v1482_v8 }
 0x666   : > { %v1484_v37 = vadd.f32 %v3099_v48, %v1483_v10 }
 0x668   : > { %v1485_v13 = vadd.f32 %v3101_v28, %v1484_v37 }
 0x66a   : > { %v1486_v17 = vadd.f32 %v3103_v5, %v1485_v13  ;;  %v2458_v13 = vcombine.low %v3702_v44, %v3702_v44  ;;  %v1595_v44 = vld [vmem:[#allocation5 + $0x28] sm:$0xff] }
 0x66c   : > { %v1487_v25 = vrot.slane %v1486_v17, 4 }
 0x66e   : > { %v1488_v50 = vadd.f32 %v1487_v25, %v1486_v17  ;;  %v1594_v17 = vld [vmem:[#allocation5 + $0x20] sm:$0xff]  ;;  %v1596_v25 = vld [vmem:[#allocation5 + $0x30] sm:$0xff] }
 0x670   : > { %v1489_v53 = vrot.slane %v1488_v50, 2 }
 0x672   : > { %v1490_v24 = vadd.f32 %v1489_v53, %v1488_v50  ;;  %v1597_v50 = vld [vmem:[#allocation5 + $0x38] sm:$0xff]  ;;  %v1598_v53 = vld [vmem:[#allocation5 + $0x40] sm:$0xff] }
 0x674   : > { %v1491_v59 = vrot.slane %v1490_v24, 1 }
 0x676   : > { %v1492_v38 = vadd.f32 %v1491_v59, %v1490_v24  ;;  %v1599_v24 = vld [vmem:[#allocation5 + $0x48] sm:$0xff]  ;;  %v1600_v59 = vld [vmem:[#allocation5 + $0x50] sm:$0xff] }
 0x678   : > { %3104 = vrcp.f32 %v1492_v38  ;;  %v1601_v38 = vld [vmem:[#allocation5 + $0x58] sm:$0xff] }
 0x682   : > { %v3105_v23 = vpop.eup %3104 }
 0x683   : > { %v1510_v47 = vmul.f32 %v3105_v23, %v3073_v18  ;;  %v1511_v61 = vmul.f32 %v3105_v23, %v3075_v34  ;;  %v1494_v58 = vmul.f32 %v3105_v23, %v3706_v26  ;;  %v1495_v14 = vmul.f32 %v3105_v23, %v3708_v1 }
 0x684   : > { %v1512_v6 = vmul.f32 %v3105_v23, %v3077_v33  ;;  %v1513_v41 = vmul.f32 %v3105_v23, %v3079_v60  ;;  %v1496_v21 = vmul.f32 %v3105_v23, %v3712_v4  ;;  %v1497_v22 = vmul.f32 %v3105_v23, %v3715_v62 }
 0x685   : > { %v1535_v27 = vpack.c.bf16 %v1511_v61, %v1510_v47  ;;  %v1527_v46 = vpack.c.bf16 %v1495_v14, %v1494_v58  ;;  %v1514_v29 = vmul.f32 %v3105_v23, %v3081_v55  ;;  %v1515_v36 = vmul.f32 %v3105_v23, %v3083_v0  ;;  %v1603_v47 = vld [vmem:[#allocation5 + $0x68] sm:$0xff]  ;;  %v1604_v61 = vld [vmem:[#allocation5 + $0x70] sm:$0xff]  ;;  %v1605_v58 = vld [vmem:[#allocation5 + $0x78] sm:$0xff] }
 0x686   : > { %v1536_v15 = vpack.c.bf16 %v1513_v41, %v1512_v6  ;;  %v1516_v30 = vmul.f32 %v3105_v23, %v3085_v42  ;;  %v1517_v18 = vmul.f32 %v3105_v23, %v3087_v45  ;;  %v1518_v34 = vmul.f32 %v3105_v23, %v3089_v63 }
 0x687   : > { %2581 = vmatprep.subr.bf16.mxu1 %v1535_v27  ;;  %v1537_v39 = vpack.c.bf16 %v1515_v36, %v1514_v29  ;;  %v1519_v26 = vmul.f32 %v3105_v23, %v3091_v2  ;;  %v1528_v1 = vpack.c.bf16 %v1497_v22, %v1496_v21  ;;  %v1520_v60 = vmul.f32 %v3105_v23, %v3093_v54 }
 0x688   : > { %2582 = vmatpush3.bf16.msra.mxu1 %v1527_v46  ;;  %v1538_v33 = vpack.c.bf16 %v1517_v18, %v1516_v30  ;;  %v1498_v4 = vmul.f32 %v3105_v23, %v3718_v19  ;;  %v1499_v62 = vmul.f32 %v3105_v23, %v3721_v40  ;;  %v1521_v31 = vmul.f32 %v3105_v23, %v3095_v16 }
 0x689   : > { %2583 = vmatprep.subr.bf16.mxu1 %v1536_v15  ;;  %v1539_v32 = vpack.c.bf16 %v1519_v26, %v1518_v34  ;;  %v1522_v55 = vmul.f32 %v3105_v23, %v3097_v20  ;;  %v1523_v0 = vmul.f32 %v3105_v23, %v3099_v48  ;;  %v1524_v35 = vmul.f32 %v3105_v23, %v3101_v28 }
 0x68a   : > { %v1540_v43 = vpack.c.bf16 %v1521_v31, %v1520_v60  ;;  %v1525_v45 = vmul.f32 %v3105_v23, %v3103_v5  ;;  %v1529_v63 = vpack.c.bf16 %v1499_v62, %v1498_v4  ;;  %v1500_v2 = vmul.f32 %v3105_v23, %v3724_v49  ;;  %v1593_v5 = vld [vmem:[#allocation5 + $0x18] sm:$0xff] }
 0x68b   : > { %v1541_v42 = vpack.c.bf16 %v1523_v0, %v1522_v55  ;;  %v1501_v8 = vmul.f32 %v3105_v23, %v3727_v51  ;;  %v1502_v40 = vmul.f32 %v3105_v23, %v3730_v56  ;;  %v1503_v16 = vmul.f32 %v3105_v23, %v3736_v57 }
 0x68c   : > { %2584 = vmatpush3.bf16.msra.mxu1 %v1528_v1  ;;  %v1542_v54 = vpack.c.bf16 %v1525_v45, %v1524_v35  ;;  %v1504_v10 = vmul.f32 %v3105_v23, %v3742_v12  ;;  %v1505_v48 = vmul.f32 %v3105_v23, %v3748_v3  ;;  %v1506_v51 = vmul.f32 %v3105_v23, %v3754_v9  ;;  %v1092_v12 = vld [vmem:[%s1091_s25] sm:$0xf] }
 0x68d   : > { %2585 = vmatprep.subr.bf16.mxu1 %v1537_v39  ;;  %v1530_v19 = vpack.c.bf16 %v1501_v8, %v1500_v2  ;;  %v1531_v20 = vpack.c.bf16 %v1503_v16, %v1502_v40  ;;  %v1507_v37 = vmul.f32 %v3105_v23, %v3760_v52  ;;  %v1508_v57 = vmul.f32 %v3105_v23, %v3766_v7  ;;  %v1590_v52 = vld [vmem:[#allocation5] sm:$0xff]  ;;  %v1591_v7 = vld [vmem:[#allocation5 + $0x8] sm:$0xff] }
 0x68e   : > { %v1532_v49 = vpack.c.bf16 %v1505_v48, %v1504_v10  ;;  %v1509_v28 = vmul.f32 %v3105_v23, %v3772_v11  ;;  %v1655_v9 = vsel %vm1158_vm4, %v1092_v12, 0  ;;  %v1592_v11 = vld [vmem:[#allocation5 + $0x10] sm:$0xff]  ;;  %v1602_v23 = vld [vmem:[#allocation5 + $0x60] sm:$0xff] }
 0x68f   : > { %v1533_v56 = vpack.c.bf16 %v1507_v37, %v1506_v51 }
 0x690   : > { %2586 = vmatpush3.bf16.msra.mxu1 %v1529_v63  ;;  %v1534_v3 = vpack.c.bf16 %v1509_v28, %v1508_v57 }
 0x691   : > { %2587 = vmatprep.subr.bf16.mxu1 %v1538_v33 }
 0x694   : > { %2588 = vmatpush3.bf16.msra.mxu1 %v1530_v19 }
 0x695   : > { %2589 = vmatprep.subr.bf16.mxu1 %v1539_v32 }
 0x698   : > { %2590 = vmatpush3.bf16.msra.mxu1 %v1531_v20 }
 0x699   : > { %2591 = vmatprep.subr.bf16.mxu1 %v1540_v43 }
 0x69c   : > { %2592 = vmatpush3.bf16.msra.mxu1 %v1532_v49 }
 0x69d   : > { %2593 = vmatprep.subr.bf16.mxu1 %v1541_v42 }
 0x6a0   : > { %2594 = vmatpush3.bf16.msra.mxu1 %v1533_v56 }
 0x6a1   : > { %2595 = vmatprep.subr.bf16.mxu1 %v1542_v54 }
 0x6a4   : > { %2596 = vmatpush3.bf16.msra.mxu1 %v1534_v3 }
 0x6a5   : > { %2799 = vmatprep.subr.msk.bf16.mxu1 %vm1158_vm4, %v1092_v12 }
 0x6a7   : > { %1583 = vmatmul.mubr.bf16.vlgmr.msra.gmra.mrb[0].mxu1 %v2458_v13 }
 0x6a8   : > { %2681 = vmatpush3.bf16.msra.mxu1 %v1655_v9  ;;  %2682 = vmatprep.mubr.msk.bf16.mxu1 %vm1109_vm3, %v1590_v52 }
 0x6af   : > { %2683 = vmatmul.mubr.msk.bf16.vlgmr.msra.gmra.mrb[4].mxu1 %vm1109_vm3, %v1591_v7 }
 0x6b0   : > { %2686 = vmatprep.mubr.msk.bf16.mxu1 %vm1109_vm3, %v1592_v11 }
 0x6b7   : > { %2687 = vmatmul.mubr.msk.bf16.gmra.mrb[8].mxu1 %vm1109_vm3, %v1593_v5 }
 0x6b8   : > { %2690 = vmatprep.mubr.msk.bf16.mxu1 %vm1109_vm3, %v1594_v17 }
 0x6bf   : > { %2691 = vmatmul.mubr.msk.bf16.gmra.mrb[12].mxu1 %vm1109_vm3, %v1595_v44 }
 0x6c0   : > { %2694 = vmatprep.mubr.msk.bf16.mxu1 %vm1109_vm3, %v1596_v25 }
 0x6c7   : > { %2695 = vmatmul.mubr.msk.bf16.gmra.mrb[16].mxu1 %vm1109_vm3, %v1597_v50 }
 0x6c8   : > { %2698 = vmatprep.mubr.msk.bf16.mxu1 %vm1109_vm3, %v1598_v53 }
 0x6cf   : > { %2699 = vmatmul.mubr.msk.bf16.gmra.mrb[20].mxu1 %vm1109_vm3, %v1599_v24 }
 0x6d0   : > { %2702 = vmatprep.mubr.msk.bf16.mxu1 %vm1109_vm3, %v1600_v59 }
 0x6d7   : > { %2703 = vmatmul.mubr.msk.bf16.gmra.mrb[24].mxu1 %vm1109_vm3, %v1601_v38 }
 0x6d8   : > { %2706 = vmatprep.mubr.msk.bf16.mxu1 %vm1109_vm3, %v1602_v23 }
 0x6df   : > { %2707 = vmatmul.mubr.msk.bf16.gmra.mrb[28].mxu1 %vm1109_vm3, %v1603_v47 }
 0x6e0   : > { %2710 = vmatprep.mubr.msk.bf16.mxu1 %vm1109_vm3, %v1604_v61 }
 0x6e7   : > { %2711 = vmatmul.mubr.msk.bf16.gmra.mrb[32].mxu1 %vm1109_vm3, %v1605_v58 }
 0x77a   : > { %v2597_v14 = vpop.f32.mrb[0].mxu1 }
 0x77b   : > { %v2598_v6 = vpop.f32.mrb[1].mxu1 }
 0x77c   : > { %v3843_v41 = vadd.f32 %v2598_v6, %v2597_v14  ;;  %v2600_v21 = vpop.f32.mrb[2].mxu1 }
 0x77d   : > { %v2601_v22 = vpop.f32.mrb[3].mxu1 }
 0x782   : > { %v3845_v27 = vpop.f32.mrb[4].mxu1 }
 0x783   : > { %v3847_v46 = vpop.f32.mrb[5].mxu1 }
 0x784   : > { %v3849_v29 = vpop.f32.mrb[6].mxu1 }
 0x785   : > { %v3851_v36 = vpop.f32.mrb[7].mxu1 }
 0x78a   : > { %v3853_v15 = vpop.f32.mrb[8].mxu1 }
 0x78b   : > { %v1820_v39 = vmax.f32 %v3845_v27, %v3853_v15  ;;  %v3857_v30 = vpop.f32.mrb[9].mxu1 }
 0x78c   : > { %v1818_v18 = vmax.f32 %v3847_v46, %v3857_v30  ;;  %v3861_v34 = vpop.f32.mrb[10].mxu1 }
 0x78d   : > { %v1821_v26 = vmax.f32 %v3849_v29, %v3861_v34  ;;  %v3865_v1 = vpop.f32.mrb[11].mxu1 }
 0x78e   : > { %v1819_v33 = vmax.f32 %v3851_v36, %v3865_v1 }
 0x792   : > { %v3869_v60 = vpop.f32.mrb[12].mxu1 }
 0x793   : > { %v1824_v4 = vmax.f32 %v1820_v39, %v3869_v60  ;;  %v3872_v62 = vpop.f32.mrb[13].mxu1 }
 0x794   : > { %v1822_v32 = vmax.f32 %v1818_v18, %v3872_v62  ;;  %v3875_v31 = vpop.f32.mrb[14].mxu1 }
 0x795   : > { %v1825_v55 = vmax.f32 %v1821_v26, %v3875_v31  ;;  %v3878_v0 = vpop.f32.mrb[15].mxu1 }
 0x796   : > { %v1823_v43 = vmax.f32 %v1819_v33, %v3878_v0 }
 0x79a   : > { %v3881_v35 = vpop.f32.mrb[16].mxu1 }
 0x79b   : > { %v1828_v42 = vmax.f32 %v1824_v4, %v3881_v35  ;;  %v3884_v45 = vpop.f32.mrb[17].mxu1 }
 0x79c   : > { %v1826_v63 = vmax.f32 %v1822_v32, %v3884_v45  ;;  %v3887_v2 = vpop.f32.mrb[18].mxu1 }
 0x79d   : > { %v1829_v8 = vmax.f32 %v1825_v55, %v3887_v2  ;;  %v3890_v54 = vpop.f32.mrb[19].mxu1 }
 0x79e   : > { %v1827_v19 = vmax.f32 %v1823_v43, %v3890_v54 }
 0x7a2   : > { %v3893_v40 = vpop.f32.mrb[20].mxu1 }
 0x7a3   : > { %v1832_v16 = vmax.f32 %v1828_v42, %v3893_v40  ;;  %v3896_v20 = vpop.f32.mrb[21].mxu1 }
 0x7a4   : > { %v1830_v10 = vmax.f32 %v1826_v63, %v3896_v20  ;;  %v3899_v48 = vpop.f32.mrb[22].mxu1 }
 0x7a5   : > { %v1833_v49 = vmax.f32 %v1829_v8, %v3899_v48  ;;  %v3902_v51 = vpop.f32.mrb[23].mxu1 }
 0x7a6   : > { %v1831_v37 = vmax.f32 %v1827_v19, %v3902_v51 }
 0x7aa   : > { %v3905_v56 = vpop.f32.mrb[24].mxu1 }
 0x7ab   : > { %v1836_v57 = vmax.f32 %v1832_v16, %v3905_v56  ;;  %v3908_v28 = vpop.f32.mrb[25].mxu1 }
 0x7ac   : > { %v1834_v12 = vmax.f32 %v1830_v10, %v3908_v28  ;;  %v3911_v3 = vpop.f32.mrb[26].mxu1 }
 0x7ad   : > { %v1837_v13 = vmax.f32 %v1833_v49, %v3911_v3  ;;  %v3914_v9 = vpop.f32.mrb[27].mxu1 }
 0x7ae   : > { %v1835_v52 = vmax.f32 %v1831_v37, %v3914_v9 }
 0x7b2   : > { %v3917_v7 = vpop.f32.mrb[28].mxu1 }
 0x7b3   : > { %v1840_v11 = vmax.f32 %v1836_v57, %v3917_v7  ;;  %v3920_v5 = vpop.f32.mrb[29].mxu1 }
 0x7b4   : > { %v1838_v17 = vmax.f32 %v1834_v12, %v3920_v5  ;;  %v3923_v44 = vpop.f32.mrb[30].mxu1 }
 0x7b5   : > { %v1841_v25 = vmax.f32 %v1837_v13, %v3923_v44  ;;  %v3926_v50 = vpop.f32.mrb[31].mxu1 }
 0x7b6   : > { %v1839_v53 = vmax.f32 %v1835_v52, %v3926_v50 }
 0x7ba   : > { %v3929_v24 = vpop.f32.mrb[32].mxu1 }
 0x7bb   : > { %v1844_v59 = vmax.f32 %v1840_v11, %v3929_v24  ;;  %v3932_v38 = vpop.f32.mrb[33].mxu1 }
 0x7bc   : > { %v1842_v23 = vmax.f32 %v1838_v17, %v3932_v38  ;;  %v3935_v47 = vpop.f32.mrb[34].mxu1 }
 0x7bd   : > { %v1845_v61 = vmax.f32 %v1841_v25, %v3935_v47  ;;  %v3938_v58 = vpop.f32.mrb[35].mxu1 }
 0x7be   : > { %v1843_v14 = vmax.f32 %v1839_v53, %v3938_v58 }
 0x7bf   : > { %v1847_v6 = vmax.f32 %v1844_v59, %v1845_v61 }
 0x7c0   : > { %v1846_v21 = vmax.f32 %v1842_v23, %v1843_v14 }
 0x7c2   : > { %v1848_v22 = vmax.f32 %v1846_v21, %v1847_v6 }
 0x7c4   : > { %v1849_v39 = vrot.slane %v1848_v22, 4 }
 0x7c6   : > { %v1850_v18 = vmax.f32 %v1848_v22, %v1849_v39  ;;  %v4007_v22 = vld [vmem:[#allocation7] sm:$0xff] }
 0x7c8   : > { %v1851_v26 = vrot.slane %v1850_v18, 2 }
 0x7ca   : > { %v1852_v33 = vmax.f32 %v1850_v18, %v1851_v26  ;;  %v2477_v18 = vcombine.high %v4007_v22, %v4007_v22 }
 0x7cc   : > { %v1853_v4 = vrot.slane %v1852_v33, 1  ;;  %2077 = vmatprep.mubr.bf16.mxu0 %v2477_v18 }
 0x7ce   : > { %v3941_v32 = vmax.f32 %v1852_v33, %v1853_v4 }
 0x7d0   : > { %v1855_v55 = vsub.f32 %v3847_v46, %v3941_v32  ;;  %v1856_v43 = vsub.f32 %v3851_v36, %v3941_v32  ;;  %v1857_v42 = vsub.f32 %v3845_v27, %v3941_v32  ;;  %v1858_v63 = vsub.f32 %v3849_v29, %v3941_v32 }
 0x7d1   : > { %v1859_v8 = vsub.f32 %v3857_v30, %v3941_v32  ;;  %v1860_v19 = vsub.f32 %v3865_v1, %v3941_v32  ;;  %v1861_v16 = vsub.f32 %v3853_v15, %v3941_v32  ;;  %v1862_v46 = vsub.f32 %v3861_v34, %v3941_v32 }
 0x7d2   : > { %v1863_v36 = vsub.f32 %v3872_v62, %v3941_v32  ;;  %v1864_v27 = vsub.f32 %v3878_v0, %v3941_v32  ;;  %v1865_v29 = vsub.f32 %v3869_v60, %v3941_v32  ;;  %v1866_v30 = vsub.f32 %v3875_v31, %v3941_v32 }
 0x7d3   : > { %v1867_v1 = vsub.f32 %v3884_v45, %v3941_v32  ;;  %v1868_v15 = vsub.f32 %v3890_v54, %v3941_v32  ;;  %v1869_v34 = vsub.f32 %v3881_v35, %v3941_v32  ;;  %v1870_v62 = vsub.f32 %v3887_v2, %v3941_v32 }
 0x7d4   : > { %v1871_v0 = vsub.f32 %v3896_v20, %v3941_v32  ;;  %v1872_v60 = vsub.f32 %v3902_v51, %v3941_v32  ;;  %v1873_v31 = vsub.f32 %v3893_v40, %v3941_v32  ;;  %v1874_v45 = vsub.f32 %v3899_v48, %v3941_v32 }
 0x7d5   : > { %v1875_v54 = vsub.f32 %v3908_v28, %v3941_v32  ;;  %v1876_v35 = vsub.f32 %v3914_v9, %v3941_v32  ;;  %v1877_v10 = vsub.f32 %v3905_v56, %v3941_v32  ;;  %v1878_v49 = vsub.f32 %v3911_v3, %v3941_v32 }
 0x7d6   : > { %v1879_v37 = vsub.f32 %v3920_v5, %v3941_v32  ;;  %v1880_v57 = vsub.f32 %v3926_v50, %v3941_v32  ;;  %v1881_v12 = vsub.f32 %v3917_v7, %v3941_v32  ;;  %v1882_v13 = vsub.f32 %v3923_v44, %v3941_v32 }
 0x7d7   : > { %v1883_v52 = vsub.f32 %v3932_v38, %v3941_v32  ;;  %v1884_v11 = vsub.f32 %v3938_v58, %v3941_v32  ;;  %v1885_v17 = vsub.f32 %v3929_v24, %v3941_v32  ;;  %v1886_v25 = vsub.f32 %v3935_v47, %v3941_v32 }
 0x7d8   : > { %v1887_v53 = vmul.f32 1.442695, %v1855_v55  ;;  %v1889_v59 = vmul.f32 1.442695, %v1856_v43  ;;  %v1891_v23 = vmul.f32 1.442695, %v1857_v42 }
 0x7d9   : > { %v1893_v61 = vmul.f32 1.442695, %v1858_v63  ;;  %v1895_v14 = vmul.f32 1.442695, %v1859_v8  ;;  %v1897_v6 = vmul.f32 1.442695, %v1860_v19 }
 0x7da   : > { %3106 = vpow2.f32 %v1887_v53  ;;  %v1899_v21 = vmul.f32 1.442695, %v1861_v16  ;;  %v1901_v39 = vmul.f32 1.442695, %v1862_v46  ;;  %v1903_v4 = vmul.f32 1.442695, %v1863_v36 }
 0x7db   : > { %3108 = vpow2.f32 %v1889_v59  ;;  %v1905_v42 = vmul.f32 1.442695, %v1864_v27  ;;  %v1907_v19 = vmul.f32 1.442695, %v1865_v29  ;;  %v1909_v36 = vmul.f32 1.442695, %v1866_v30 }
 0x7dc   : > { %3110 = vpow2.f32 %v1891_v23  ;;  %v1911_v23 = vmul.f32 1.442695, %v1867_v1  ;;  %v1917_v1 = vmul.f32 1.442695, %v1870_v62  ;;  %v1937_v56 = vmul.f32 1.442695, %v1880_v57 }
 0x7dd   : > { %3112 = vpow2.f32 %v1893_v61  ;;  %v1939_v3 = vmul.f32 1.442695, %v1881_v12  ;;  %v1941_v5 = vmul.f32 1.442695, %v1882_v13  ;;  %v1943_v50 = vmul.f32 1.442695, %v1883_v52 }
 0x7de   : > { %3114 = vpow2.f32 %v1895_v14  ;;  %v1913_v14 = vmul.f32 1.442695, %v1868_v15  ;;  %v1919_v15 = vmul.f32 1.442695, %v1871_v0  ;;  %v1945_v7 = vmul.f32 1.442695, %v1884_v11 }
 0x7df   : > { %3116 = vpow2.f32 %v1897_v6  ;;  %v1947_v44 = vmul.f32 1.442695, %v1885_v17  ;;  %v1949_v38 = vmul.f32 1.442695, %v1886_v25 }
 0x7e0   : > { %3118 = vpow2.f32 %v1899_v21  ;;  %v1915_v21 = vmul.f32 1.442695, %v1869_v34 }
 0x7e1   : > { %3120 = vpow2.f32 %v1901_v39 }
 0x7e2   : > { %3122 = vpow2.f32 %v1903_v4 }
 0x7e3   : > { %3124 = vpow2.f32 %v1905_v42  ;;  %v1921_v42 = vmul.f32 1.442695, %v1872_v60 }
 0x7e4   : > { %v4011_v26 = vpop.eup %3106  ;;  %3126 = vpow2.f32 %v1907_v19  ;;  %v1925_v19 = vmul.f32 1.442695, %v1874_v45 }
 0x7e5   : > { %v4013_v33 = vpop.eup %3108  ;;  %3128 = vpow2.f32 %v1909_v36  ;;  %v1929_v36 = vmul.f32 1.442695, %v1876_v35  ;;  %v1935_v35 = vmul.f32 1.442695, %v1879_v37 }
 0x7e6   : > { %v1951_v55 = vadd.f32 %v4013_v33, %v4011_v26  ;;  %v4017_v43 = vpop.eup %3110  ;;  %3130 = vpow2.f32 %v1911_v23  ;;  %v1933_v23 = vmul.f32 1.442695, %v1878_v49 }
 0x7e7   : > { %v4020_v8 = vpop.eup %3112  ;;  %3132 = vpow2.f32 %v1913_v14 }
 0x7e8   : > { %v1952_v63 = vadd.f32 %v4017_v43, %v1951_v55  ;;  %v4023_v46 = vpop.eup %3114  ;;  %3134 = vpow2.f32 %v1915_v21 }
 0x7e9   : > { %v4026_v59 = vpop.eup %3116  ;;  %3136 = vpow2.f32 %v1917_v1 }
 0x7ea   : > { %v1953_v16 = vadd.f32 %v4020_v8, %v1952_v63  ;;  %v4029_v61 = vpop.eup %3118  ;;  %3138 = vpow2.f32 %v1919_v15  ;;  %v1923_v63 = vmul.f32 1.442695, %v1873_v31 }
 0x7eb   : > { %v4032_v6 = vpop.eup %3120  ;;  %3140 = vpow2.f32 %v1921_v42 }
 0x7ec   : > { %v1954_v53 = vadd.f32 %v4023_v46, %v1953_v16  ;;  %v4035_v39 = vpop.eup %3122  ;;  %3142 = vpow2.f32 %v1923_v63  ;;  %v1927_v16 = vmul.f32 1.442695, %v1875_v54 }
 0x7ed   : > { %v4041_v4 = vpop.eup %3124  ;;  %3144 = vpow2.f32 %v1925_v19 }
 0x7ee   : > { %v1955_v27 = vadd.f32 %v4026_v59, %v1954_v53  ;;  %v4047_v55 = vpop.eup %3126  ;;  %3146 = vpow2.f32 %v1927_v16  ;;  %v1931_v53 = vmul.f32 1.442695, %v1877_v10 }
 0x7ef   : > { %v4053_v62 = vpop.eup %3128  ;;  %3148 = vpow2.f32 %v1929_v36 }
 0x7f0   : > { %v1956_v29 = vadd.f32 %v4029_v61, %v1955_v27  ;;  %v4059_v0 = vpop.eup %3130  ;;  %3150 = vpow2.f32 %v1931_v53 }
 0x7f1   : > { %v4065_v60 = vpop.eup %3132  ;;  %3152 = vpow2.f32 %v1933_v23 }
 0x7f2   : > { %v1957_v30 = vadd.f32 %v4032_v6, %v1956_v29  ;;  %v4071_v31 = vpop.eup %3134  ;;  %3154 = vpow2.f32 %v1935_v35 }
 0x7f3   : > { %v4077_v45 = vpop.eup %3136  ;;  %3156 = vpow2.f32 %v1937_v56 }
 0x7f4   : > { %v1958_v18 = vadd.f32 %v4035_v39, %v1957_v30  ;;  %v3139_v54 = vpop.eup %3138  ;;  %3158 = vpow2.f32 %v1939_v3 }
 0x7f5   : > { %v3141_v9 = vpop.eup %3140  ;;  %3160 = vpow2.f32 %v1941_v5 }
 0x7f6   : > { %v1959_v34 = vadd.f32 %v4041_v4, %v1958_v18  ;;  %v3143_v29 = vpop.eup %3142  ;;  %3162 = vpow2.f32 %v1943_v50 }
 0x7f7   : > { %v3145_v21 = vpop.eup %3144  ;;  %3164 = vpow2.f32 %v1945_v7 }
 0x7f8   : > { %v1960_v2 = vadd.f32 %v4047_v55, %v1959_v34  ;;  %v3147_v30 = vpop.eup %3146  ;;  %3166 = vpow2.f32 %v1947_v44 }
 0x7f9   : > { %v3149_v1 = vpop.eup %3148  ;;  %3168 = vpow2.f32 %v1949_v38 }
 0x7fa   : > { %v1961_v20 = vadd.f32 %v4053_v62, %v1960_v2  ;;  %v3151_v18 = vpop.eup %3150 }
 0x7fb   : > { %v3153_v15 = vpop.eup %3152 }
 0x7fc   : > { %v1962_v51 = vadd.f32 %v4059_v0, %v1961_v20  ;;  %v3155_v34 = vpop.eup %3154 }
 0x7fd   : > { %v3157_v42 = vpop.eup %3156 }
 0x7fe   : > { %v1963_v40 = vadd.f32 %v4065_v60, %v1962_v51  ;;  %v3159_v58 = vpop.eup %3158 }
 0x7ff   : > { %v3161_v63 = vpop.eup %3160 }
 0x800   : > { %v1964_v48 = vadd.f32 %v4071_v31, %v1963_v40  ;;  %v3163_v19 = vpop.eup %3162 }
 0x801   : > { %v3165_v24 = vpop.eup %3164 }
 0x802   : > { %v1965_v28 = vadd.f32 %v4077_v45, %v1964_v48  ;;  %v3167_v16 = vpop.eup %3166 }
 0x803   : > { %v3169_v36 = vpop.eup %3168 }
 0x804   : > { %v1966_v27 = vadd.f32 %v3139_v54, %v1965_v28 }
 0x806   : > { %v1967_v14 = vadd.f32 %v3141_v9, %v1966_v27 }
 0x808   : > { %v1968_v10 = vadd.f32 %v3143_v29, %v1967_v14 }
 0x80a   : > { %v1969_v49 = vadd.f32 %v3145_v21, %v1968_v10 }
 0x80c   : > { %v1970_v37 = vadd.f32 %v3147_v30, %v1969_v49 }
 0x80e   : > { %v1971_v57 = vadd.f32 %v3149_v1, %v1970_v37 }
 0x810   : > { %v1972_v12 = vadd.f32 %v3151_v18, %v1971_v57 }
 0x812   : > { %v1973_v13 = vadd.f32 %v3153_v15, %v1972_v12 }
 0x814   : > { %v1974_v52 = vadd.f32 %v3155_v34, %v1973_v13 }
 0x816   : > { %v1975_v2 = vadd.f32 %v3157_v42, %v1974_v52 }
 0x818   : > { %v1976_v11 = vadd.f32 %v3159_v58, %v1975_v2 }
 0x81a   : > { %v1977_v20 = vadd.f32 %v3161_v63, %v1976_v11 }
 0x81c   : > { %v1978_v51 = vadd.f32 %v3163_v19, %v1977_v20 }
 0x81e   : > { %v1979_v17 = vadd.f32 %v3165_v24, %v1978_v51 }
 0x820   : > { %v1980_v40 = vadd.f32 %v3167_v16, %v1979_v17 }
 0x822   : > { %v1981_v48 = vadd.f32 %v3169_v36, %v1980_v40 }
 0x824   : > { %v1982_v53 = vrot.slane %v1981_v48, 4 }
 0x826   : > { %v1983_v47 = vadd.f32 %v1982_v53, %v1981_v48  ;;  %v3232_v48 = vmov 0   ;;  %v2089_v53 = vld [vmem:[%s4199_s7 + $0x8] sm:$0xff] }
 0x827   : > { %3035 = vset.pattern.permute.xlu0 %v3232_v48 }
 0x828   : > { %v1984_v32 = vrot.slane %v1983_v47, 2 }
 0x82a   : > { %v1985_v25 = vadd.f32 %v1984_v32, %v1983_v47 }
 0x82c   : > { %v1986_v28 = vrot.slane %v1985_v25, 1 }
 0x82e   : > { %v1987_v23 = vadd.f32 %v1986_v28, %v1985_v25 }
 0x830   : > { %3170 = vrcp.f32 %v1987_v23 }
 0x83a   : > { %v3171_v27 = vpop.eup %3170 }
 0x83b   : > { %v2005_v35 = vmul.f32 %v3171_v27, %v3139_v54  ;;  %v2006_v14 = vmul.f32 %v3171_v27, %v3141_v9  ;;  %v1989_v56 = vmul.f32 %v3171_v27, %v4011_v26  ;;  %v1990_v10 = vmul.f32 %v3171_v27, %v4013_v33 }
 0x83c   : > { %v2007_v3 = vmul.f32 %v3171_v27, %v3143_v29  ;;  %v2008_v49 = vmul.f32 %v3171_v27, %v3145_v21  ;;  %v1991_v5 = vmul.f32 %v3171_v27, %v4017_v43  ;;  %v1992_v37 = vmul.f32 %v3171_v27, %v4020_v8 }
 0x83d   : > { %v2030_v50 = vpack.c.bf16 %v2006_v14, %v2005_v35  ;;  %v2022_v57 = vpack.c.bf16 %v1990_v10, %v1989_v56  ;;  %v2009_v7 = vmul.f32 %v3171_v27, %v3147_v30  ;;  %v2010_v12 = vmul.f32 %v3171_v27, %v3149_v1  ;;  %v1085_v14 = vld [vmem:[%s1084_s27] sm:$0xff] }
 0x83e   : > { %v2031_v44 = vpack.c.bf16 %v2008_v49, %v2007_v3  ;;  %v2011_v38 = vmul.f32 %v3171_v27, %v3151_v18  ;;  %v2012_v54 = vmul.f32 %v3171_v27, %v3153_v15  ;;  %v2013_v9 = vmul.f32 %v3171_v27, %v3155_v34  ;;  %v1086_v3 = vld [vmem:[%s1084_s27 + $0x10] sm:$0xff] }
 0x83f   : > { %2620 = vmatprep.subr.bf16.mxu0 %v2030_v50  ;;  %v2032_v13 = vpack.c.bf16 %v2010_v12, %v2009_v7  ;;  %v2014_v26 = vmul.f32 %v3171_v27, %v3157_v42  ;;  %v2023_v33 = vpack.c.bf16 %v1992_v37, %v1991_v5  ;;  %v2015_v21 = vmul.f32 %v3171_v27, %v3159_v58  ;;  %v1081_v37 = vld [vmem:[%s1080_s28] sm:$0xff]  ;;  %v1082_v50 = vld [vmem:[%s1080_s28 + $0x10] sm:$0xff] }
 0x840   : > { %2621 = vmatpush3.bf16.msra.mxu0 %v2022_v57  ;;  %v2033_v29 = vpack.c.bf16 %v2012_v54, %v2011_v38  ;;  %v1993_v43 = vmul.f32 %v3171_v27, %v4023_v46  ;;  %v1994_v8 = vmul.f32 %v3171_v27, %v4026_v59  ;;  %v2016_v2 = vmul.f32 %v3171_v27, %v3161_v63 }
 0x841   : > { %2622 = vmatprep.subr.bf16.mxu0 %v2031_v44  ;;  %v2034_v52 = vpack.c.bf16 %v2014_v26, %v2013_v9  ;;  %v2017_v30 = vmul.f32 %v3171_v27, %v3163_v19  ;;  %v2018_v1 = vmul.f32 %v3171_v27, %v3165_v24  ;;  %v2019_v20 = vmul.f32 %v3171_v27, %v3167_v16 }
 0x842   : > { %v2035_v11 = vpack.c.bf16 %v2016_v2, %v2015_v21  ;;  %v2020_v15 = vmul.f32 %v3171_v27, %v3169_v36  ;;  %v2024_v34 = vpack.c.bf16 %v1994_v8, %v1993_v43  ;;  %v1995_v42 = vmul.f32 %v3171_v27, %v4029_v61 }
 0x843   : > { %v2036_v18 = vpack.c.bf16 %v2018_v1, %v2017_v30  ;;  %v1996_v51 = vmul.f32 %v3171_v27, %v4032_v6  ;;  %v1997_v59 = vmul.f32 %v3171_v27, %v4035_v39  ;;  %v1998_v63 = vmul.f32 %v3171_v27, %v4041_v4 }
 0x844   : > { %2623 = vmatpush3.bf16.msra.mxu0 %v2023_v33  ;;  %v2037_v58 = vpack.c.bf16 %v2020_v15, %v2019_v20  ;;  %v1999_v24 = vmul.f32 %v3171_v27, %v4047_v55  ;;  %v2000_v17 = vmul.f32 %v3171_v27, %v4053_v62  ;;  %v2001_v6 = vmul.f32 %v3171_v27, %v4059_v0 }
 0x845   : > { %2624 = vmatprep.subr.bf16.mxu0 %v2032_v13  ;;  %v2025_v46 = vpack.c.bf16 %v1996_v51, %v1995_v42  ;;  %v2026_v19 = vpack.c.bf16 %v1998_v63, %v1997_v59  ;;  %v2002_v16 = vmul.f32 %v3171_v27, %v4065_v60  ;;  %v2003_v39 = vmul.f32 %v3171_v27, %v4071_v31  ;;  %v2085_v31 = vld [vmem:[%s4198_s6] sm:$0xff] }
 0x846   : > { %v2027_v61 = vpack.c.bf16 %v2000_v17, %v1999_v24  ;;  %v2004_v4 = vmul.f32 %v3171_v27, %v4077_v45  ;;  %v2102_v55 = vpack.c.bf16 %v3843_v41, %v3843_v41  ;;  %v2476_v62 = vcombine.low %v4007_v22, %v4007_v22  ;;  %v2086_v45 = vld [vmem:[%s4198_s6 + $0x8] sm:$0xff]  ;;  %v2088_v22 = vld [vmem:[%s4199_s7] sm:$0xff] }
 0x847   : > { %v2028_v40 = vpack.c.bf16 %v2002_v16, %v2001_v6  ;;  %v3230_v0 = vmov 0.0   ;;  %v2087_v41 = vpack.c.bf16 %v2086_v45, %v2085_v31  ;;  %2092 = vperm.xlu0 %3035, %v2088_v22  }
 0x848   : > { %2625 = vmatpush3.bf16.msra.mxu0 %v2024_v34  ;;  %v2029_v36 = vpack.c.bf16 %v2004_v4, %v2003_v39  ;;  %v2107_v60 = vsel %vm1158_vm4, %v2102_v55, 0 }
 0x849   : > { %2626 = vmatprep.subr.bf16.mxu0 %v2033_v29 }
 0x84b   : > { %2097 = vperm.xlu0 %3035, %v2089_v53  }
 0x84c   : > { %2627 = vmatpush3.bf16.msra.mxu0 %v2025_v46 }
 0x84d   : > { %2628 = vmatprep.subr.bf16.mxu0 %v2034_v52 }
 0x850   : > { %2629 = vmatpush3.bf16.msra.mxu0 %v2026_v19 }
 0x851   : > { %2630 = vmatprep.subr.bf16.mxu0 %v2035_v11 }
 0x854   : > { %2631 = vmatpush3.bf16.msra.mxu0 %v2027_v61 }
 0x855   : > { %2632 = vmatprep.subr.bf16.mxu0 %v2036_v18 }
 0x858   : > { %2633 = vmatpush3.bf16.msra.mxu0 %v2028_v40 }
 0x859   : > { %2634 = vmatprep.subr.bf16.mxu0 %v2037_v58 }
 0x85c   : > { %2635 = vmatpush3.bf16.msra.mxu0 %v2029_v36 }
 0x85d   : > { %2714 = vmatprep.subr.bf16.mxu0 %v3230_v0 }
 0x85f   : > { %2078 = vmatmul.mubr.bf16.vlgmr.msra.gmra.mrb[32].mxu0 %v2476_v62 }
 0x860   : > { %2715 = vmatpush3.bf16.msra.mxu0 %v2107_v60  ;;  %2716 = vmatprep.mubr.msk.bf16.mxu0 %vm3231_vm5, %v3230_v0 }
 0x861   : > { %2720 = vmatprep.subr.bf16.mxu0 %v3230_v0 }
 0x867   : > { %2717 = vmatmul.mubr.msk.bf16.vlgmr.msra.gmra.mrb[36].mxu0 %vm1109_vm3, %v2087_v41 }
 0x868   : > { %2722 = vmatprep.mubr.msk.bf16.mxu0 %vm3231_vm5, %v3230_v0 }
 0x8c6   : > { %v2093_v56 = vpop.permute.xlu0 %2092 }
 0x8c7   : > { %v2154_v10 = vadd.f32 %v2093_v56, %v1085_v14  ;;  %v2100_v57 = vadd.f32 %v2093_v56, %v1081_v37 }
 0x8ca   : > { %v2098_v49 = vpop.permute.xlu0 %2097 }
 0x8cb   : > { %v2155_v5 = vadd.f32 %v2098_v49, %v1086_v3  ;;  %v2101_v7 = vadd.f32 %v2098_v49, %v1082_v50 }
 0x932   : > { %v2636_v47 = vpop.f32.mrb[32].mxu0 }
 0x933   : > { %v2637_v32 = vpop.f32.mrb[33].mxu0 }
 0x934   : > { %v2638_v25 = vadd.f32 %v2637_v32, %v2636_v47  ;;  %v2639_v28 = vpop.f32.mrb[34].mxu0 }
 0x935   : > { %v2640_v23 = vpop.f32.mrb[35].mxu0 }
 0x936   : > { %v2156_v27 = vpack.c.bf16 %v2638_v25, %v2638_v25 }
 0x938   : > { %v2158_v35 = vsel %vm1158_vm4, %v2156_v27, 0 }
 0x939   : > { %2721 = vmatpush3.bf16.msra.mxu0 %v2158_v35 }
 0x93a   : > { %v2143_v12 = vpop.f32.mrb[36].mxu0 }
 0x93b   : > { %v2150_v44 = vadd.f32 %v2143_v12, %v2100_v57  ;;  %v2718_v13 = vpop.f32.mrb[37].mxu0 }
 0x93c   : > { %2723 = vmatmul.mubr.msk.bf16.vlgmr.msra.gmra.mrb[40].mxu0 %vm1109_vm3, %v2087_v41  ;;  %v2146_v38 = vpop.f32.mrb[38].mxu0 }
 0x93d   : > { %2152 = vst [vmem:[%s3355_s22] sm:$0xff] %v2150_v44  ;;  %v2151_v54 = vadd.f32 %v2146_v38, %v2101_v7  ;;  %v2719_v9 = vpop.f32.mrb[39].mxu0 }
 0x93f   : > { %2153 = vst [vmem:[%s3355_s22 + $0x8] sm:$0xff] %v2151_v54 }
 0x944   : > { %v2249_v52 = vld [vmem:[%s3355_s22] sm:$0xff] (%p3329_p5) }
 0x945   : > { %2250 = vst [vmem:[%s2219_s30] sm:$0xff] (%p3329_p5), %v2249_v52 }
 0x946   : > { %v2251_v2 = vld [vmem:[%s3355_s22 + $0x8] sm:$0xff] (%p3329_p5) }
 0x947   : > { %2252 = vst [vmem:[%s2219_s30 + $0x10] sm:$0xff] (%p3329_p5), %v2251_v2 }
 0xa0e   : > { %2215 = sbr.rel (!%p3329_p5) target bundleno = 2581 (0xa15), region = 60 }
 0xa0f   : > { %v2194_v26 = vpop.f32.mrb[40].mxu0 }
 0xa10   : > { %v2201_v33 = vadd.f32 %v2194_v26, %v2154_v10  ;;  %v2724_v29 = vpop.f32.mrb[41].mxu0 }
 0xa11   : > { %v2197_v21 = vpop.f32.mrb[42].mxu0 }
 0xa12   : > { %2203 = vst [vmem:[%s3357_s23] sm:$0xff] %v2201_v33  ;;  %v2202_v43 = vadd.f32 %v2197_v21, %v2155_v5  ;;  %v2725_v8 = vpop.f32.mrb[43].mxu0 }
 0xa14   : > { %2204 = vst [vmem:[%s3357_s23 + $0x8] sm:$0xff] %v2202_v43 }
 0xa15 PF: > { %2258 = sbr.rel (!%p3329_p5) target bundleno = 2589 (0xa1d), region = 98  ;;  %s2484_s17 = sshll.u32 (%p3329_p5), %s3214_s12, 2 }
 0xa16   : > { %s2260_s25 = sadd.s32 (%p3329_p5), %s3210_s11, %s2484_s17 }
 0xa17   : > { %s2485_s22 = sshll.u32 (%p3329_p5), %s2260_s25, 3 }
 0xa18   : > { %s2262_s28 = scalar_lea.vmem (%p3329_p5), %s4201_s9, %s2485_s22 }
 0xa19   : > { %v2292_v30 = vld [vmem:[%s3357_s23] sm:$0xff] (%p3329_p5) }
 0xa1a   : > { %2293 = vst [vmem:[%s2262_s28] sm:$0xff] (%p3329_p5), %v2292_v30 }
 0xa1b   : > { %v2294_v1 = vld [vmem:[%s3357_s23 + $0x8] sm:$0xff] (%p3329_p5) }
 0xa1c   : > { %2295 = vst [vmem:[%s2262_s28 + $0x10] sm:$0xff] %v2294_v1 }
 0xa1d PF: > { %s20_s15 = sadd.s32 1, %s3226_s15   ;;  %s4207_s20 = sld [smem:[#allocation10_spill]] }
 0xa1e   : > { %p17_p11 = scmp.ge.s32.totalorder %s20_s15, 6   ;;  %s4208_s16 = sld [smem:[#allocation11_spill]] }
 0xa1f   : > { %s4209_s30 = smov %s3206_s10  ;;  %s4210_s10 = smov %s3340_s24 }
 0xa20   : > { %s4211_s11 = smov %s3218_s13  ;;  %s4212_s12 = smov %s3222_s14 }
 0xa21   :  { %19 = sbr.rel (!%p17_p11) target bundleno = 4 (0x4), region = 181 }
 0xa23   : > { %s4213_s13 = smov %s4207_s20 }
 0xa24   : > { %s4214_s14 = smov %s4208_s16 }

</bundles_post_ra>
